<compile_context>
chip_gen: v7x
topology: tpu7x:2x2x1
jax: 0.10.0
libtpu: 0.0.40
codegen_flags: <defaults>
</compile_context>

<pallas_src>
import functools

import numpy as np
import jax
import jax.numpy as jnp
from jax import lax
from jax.experimental import pallas as pl
from jax.experimental.pallas import tpu as pltpu

EPS = 1e-5


def basic_block_kernel(x_ref, masks_ref, w1_ref, g1_ref, b1_ref,
                       w2_ref, g2_ref, b2_ref, out_ref, slab_ref, *, W):
    """Fused BasicBlock forward, channels-major lane-dense layout.

    x_ref    : (N, C, HW)   f32   input, per-image spatial flattened on lanes
    masks_ref: (9, HW)      f32   precomputed 3x3 "same"-conv border masks
    w{1,2}   : (C, 9*C)     bf16  conv taps, column = (dy*3+dx)*Cin + cin
    g*/b*    : (C, 1)       f32   BatchNorm affine params
    out_ref  : (N, C, HW)   f32
    slab_ref : (9*C, N*HW)  bf16  VMEM scratch holding the im2col slab
    """
    N, C, HW = x_ref.shape
    P = N * HW
    f32 = jnp.float32
    inv_n = 1.0 / P

    def conv3x3(get_img, w):
        # Build the (9*Cin, N*HW) im2col slab: per image, 9 lane-rolled (and,
        # except for the center tap, border-masked) copies of the input,
        # stacked along the sublane axis.  Mask multiply in f32; cast to bf16
        # only at the slab store.
        for n in range(N):
            v = get_img(n)                                    # (C, HW) f32
            for k in range(9):
                oy, ox = k // 3 - 1, k % 3 - 1
                d = oy * W + ox                               # flat tap shift
                # result[f] = v[(f + d) % HW]  (np.roll semantics, shift = -d)
                shifted = v if d == 0 else pltpu.roll(v, (-d) % HW, 1)
                if k != 4:                                    # center: no mask
                    shifted = shifted * masks_ref[k:k + 1, :]
                slab_ref[k * C:(k + 1) * C, n * HW:(n + 1) * HW] = (
                    shifted.astype(jnp.bfloat16))
        # Single MXU matmul per conv: (C, 9C) x (9C, N*HW), bf16 in, f32 acc.
        return jnp.dot(w, slab_ref[...], preferred_element_type=f32)

    def bn_train(t, g_ref, b_ref):
        # Training-mode BatchNorm2d, biased batch stats over (N, H, W), fused
        # into one sum/sumsq pass and a single per-channel FMA.  Variance is
        # clamped so f32 cancellation can never feed rsqrt a negative value.
        s1 = jnp.sum(t, axis=1, keepdims=True)
        s2 = jnp.sum(t * t, axis=1, keepdims=True)
        m = s1 * inv_n
        var = jnp.maximum(s2 * inv_n - m * m, 0.0)
        scale = g_ref[...] * lax.rsqrt(var + EPS)             # (C, 1)
        return t * scale + (b_ref[...] - m * scale)

    # conv1 reads per-image slices straight from the (N, C, HW) input.
    y = bn_train(conv3x3(lambda n: x_ref[n], w1_ref[...]), g1_ref, b1_ref)
    y = jnp.maximum(y, 0.0)
    # conv2 reads per-image column slices of the channels-major intermediate.
    y = bn_train(conv3x3(lambda n: y[:, n * HW:(n + 1) * HW], w2_ref[...]),
                 g2_ref, b2_ref)
    # Identity shortcut + relu, written back per image (no transpose needed).
    for n in range(N):
        out_ref[n] = jnp.maximum(y[:, n * HW:(n + 1) * HW] + x_ref[n], 0.0)


def _border_masks(H, W):
    """(9, H*W) f32 masks zeroing taps that fall outside the 'same' padding."""
    yy, xx = np.meshgrid(np.arange(H), np.arange(W), indexing="ij")
    fy, fx = yy.reshape(-1), xx.reshape(-1)
    m = np.ones((9, H * W), np.float32)
    for k in range(9):
        oy, ox = k // 3 - 1, k % 3 - 1
        ok = ((fy + oy >= 0) & (fy + oy < H) & (fx + ox >= 0) & (fx + ox < W))
        m[k] = ok.astype(np.float32)
    return jnp.asarray(m)


def basic_block_forward(x_nchw, params):
    """x_nchw: (N, C, H, W) f32.  params: (w1, g1, b1, w2, g2, b2) PyTorch shapes."""
    w1, g1, b1, w2, g2, b2 = params
    N, C, H, W = x_nchw.shape
    Cout = w1.shape[0]
    assert C == Cout == w1.shape[1], \
        "identity-shortcut configuration only (stride=1, in_planes==planes)"
    HW = H * W

    # Free, contiguous reshape only — no NCHW transpose passes over HBM.
    x_flat = x_nchw.reshape(N, C, HW).astype(jnp.float32)
    masks = _border_masks(H, W)

    def taps(w_oihw):
        # (Cout, Cin, 3, 3) -> (Cout, 3, 3, Cin) -> (Cout, 9*Cin); bf16 operands.
        return jnp.transpose(w_oihw, (0, 2, 3, 1)).reshape(Cout, 9 * C).astype(jnp.bfloat16)

    def col(v):
        return v.reshape(C, 1).astype(jnp.float32)

    vmem = pl.BlockSpec(memory_space=pltpu.MemorySpace.VMEM)
    out_flat = pl.pallas_call(
        functools.partial(basic_block_kernel, W=W),
        out_shape=jax.ShapeDtypeStruct((N, Cout, HW), jnp.float32),
        in_specs=[vmem] * 8,
        out_specs=vmem,
        scratch_shapes=[pltpu.VMEM((9 * C, N * HW), jnp.bfloat16)],
        compiler_params=pltpu.CompilerParams(vmem_limit_bytes=32 * 1024 * 1024),
    )(x_flat, masks, taps(w1), col(g1), col(b1), taps(w2), col(g2), col(b2))

    return out_flat.reshape(N, Cout, H, W)


def ref_forward(x, w1, g1, b1, w2, g2, b2):
    """Pure-JAX f32 reference (NCHW), training-mode BatchNorm."""
    dn = ('NCHW', 'OIHW', 'NCHW')

    def bn(t, g, b):
        m = t.mean(axis=(0, 2, 3), keepdims=True)
        v = ((t - m) ** 2).mean(axis=(0, 2, 3), keepdims=True)
        return (t - m) / jnp.sqrt(v + EPS) * g.reshape(1, -1, 1, 1) + b.reshape(1, -1, 1, 1)

    y = lax.conv_general_dilated(x, w1, (1, 1), ((1, 1), (1, 1)), dimension_numbers=dn)
    y = jax.nn.relu(bn(y, g1, b1))
    y = lax.conv_general_dilated(y, w2, (1, 1), ((1, 1), (1, 1)), dimension_numbers=dn)
    y = bn(y, g2, b2)
    return jax.nn.relu(y + x)


if __name__ == "__main__":
    N, C, H, W = 2, 4, 16, 16
    key = jax.random.PRNGKey(0)
    k1, k2, kx = jax.random.split(key, 3)

    # Deterministic parameter init (shapes from BasicBlock.__init__).
    w1 = jax.random.normal(k1, (C, C, 3, 3), jnp.float32) * 0.1   # conv1.weight
    w2 = jax.random.normal(k2, (C, C, 3, 3), jnp.float32) * 0.1   # conv2.weight
    g1 = jnp.ones((C,), jnp.float32)    # bn1.weight (PyTorch default init)
    b1 = jnp.zeros((C,), jnp.float32)   # bn1.bias
    g2 = jnp.ones((C,), jnp.float32)    # bn2.weight
    b2 = jnp.zeros((C,), jnp.float32)   # bn2.bias

    x = jax.random.normal(kx, (N, C, H, W), jnp.float32)

    out = jax.block_until_ready(basic_block_forward(x, (w1, g1, b1, w2, g2, b2)))
    ref = jax.block_until_ready(ref_forward(x, w1, g1, b1, w2, g2, b2))

    assert out.shape == (N, C, H, W) and out.dtype == jnp.float32
    # Kernel uses bf16 MXU operands (f32 accumulation and f32 BN stats);
    # tolerance vs the f32 reference is sized for bf16 operand rounding
    # propagated through two convs + two normalizations.
    np.testing.assert_allclose(np.asarray(out), np.asarray(ref), rtol=3e-2, atol=3e-2)
    print("KERNEL_OK")
</pallas_src>

<mosaic_0001>
module attributes {stable_mosaic.version = 11 : i64} {
  func.func @basic_block_kernel(%arg0: memref<2x4x256xf32, #tpu.memory_space<vmem>>, %arg1: memref<9x256xf32, #tpu.memory_space<vmem>>, %arg2: memref<4x36xbf16, #tpu.memory_space<vmem>>, %arg3: memref<4x1xf32, #tpu.memory_space<vmem>>, %arg4: memref<4x1xf32, #tpu.memory_space<vmem>>, %arg5: memref<4x36xbf16, #tpu.memory_space<vmem>>, %arg6: memref<4x1xf32, #tpu.memory_space<vmem>>, %arg7: memref<4x1xf32, #tpu.memory_space<vmem>>, %arg8: memref<2x4x256xf32, #tpu.memory_space<vmem>>, %arg9: memref<36x512xbf16, #tpu.memory_space<vmem>>) attributes {dimension_semantics = [], scalar_prefetch = 0 : i64, scratch_operands = 1 : i64, tpu.core_type = #tpu.core_type<tc>} {
    %c0 = arith.constant 0 : index
    %c0_0 = arith.constant 0 : index
    %0 = vector.load %arg2[%c0, %c0_0] : memref<4x36xbf16, #tpu.memory_space<vmem>>, vector<4x36xbf16>
    %c0_1 = arith.constant 0 : index
    %c0_2 = arith.constant 0 : index
    %c0_3 = arith.constant 0 : index
    %1 = vector.load %arg0[%c0_1, %c0_2, %c0_3] : memref<2x4x256xf32, #tpu.memory_space<vmem>>, vector<1x4x256xf32>
    %2 = vector.shape_cast %1 : vector<1x4x256xf32> to vector<4x256xf32>
    %c17_i32 = arith.constant 17 : i32
    %3 = tpu.dynamic_rotate %2 by %c17_i32 dim 1 : vector<4x256xf32>, i32 -> vector<4x256xf32>
    %c0_4 = arith.constant 0 : index
    %c0_5 = arith.constant 0 : index
    %4 = vector.load %arg1[%c0_4, %c0_5] : memref<9x256xf32, #tpu.memory_space<vmem>>, vector<1x256xf32>
    %5 = vector.broadcast %4 : vector<1x256xf32> to vector<4x256xf32>
    %6 = arith.mulf %3, %5 : vector<4x256xf32>
    %7 = arith.truncf %6 : vector<4x256xf32> to vector<4x256xbf16>
    %c0_6 = arith.constant 0 : index
    %c0_7 = arith.constant 0 : index
    %8 = vector.load %arg9[%c0_6, %c0_7] : memref<36x512xbf16, #tpu.memory_space<vmem>>, vector<4x256xbf16>
    tpu.vector_store %arg9[%c0_6, %c0_7], %7 {strides = array<i32>} : memref<36x512xbf16, #tpu.memory_space<vmem>>, vector<4x256xbf16>,
    %c16_i32 = arith.constant 16 : i32
    %9 = tpu.dynamic_rotate %2 by %c16_i32 dim 1 : vector<4x256xf32>, i32 -> vector<4x256xf32>
    %c1 = arith.constant 1 : index
    %c0_8 = arith.constant 0 : index
    %10 = vector.load %arg1[%c1, %c0_8] : memref<9x256xf32, #tpu.memory_space<vmem>>, vector<1x256xf32>
    %11 = vector.broadcast %10 : vector<1x256xf32> to vector<4x256xf32>
    %12 = arith.mulf %9, %11 : vector<4x256xf32>
    %13 = arith.truncf %12 : vector<4x256xf32> to vector<4x256xbf16>
    %c4 = arith.constant 4 : index
    %c0_9 = arith.constant 0 : index
    %14 = vector.load %arg9[%c4, %c0_9] : memref<36x512xbf16, #tpu.memory_space<vmem>>, vector<4x256xbf16>
    tpu.vector_store %arg9[%c4, %c0_9], %13 {strides = array<i32>} : memref<36x512xbf16, #tpu.memory_space<vmem>>, vector<4x256xbf16>,
    %c15_i32 = arith.constant 15 : i32
    %15 = tpu.dynamic_rotate %2 by %c15_i32 dim 1 : vector<4x256xf32>, i32 -> vector<4x256xf32>
    %c2 = arith.constant 2 : index
    %c0_10 = arith.constant 0 : index
    %16 = vector.load %arg1[%c2, %c0_10] : memref<9x256xf32, #tpu.memory_space<vmem>>, vector<1x256xf32>
    %17 = vector.broadcast %16 : vector<1x256xf32> to vector<4x256xf32>
    %18 = arith.mulf %15, %17 : vector<4x256xf32>
    %19 = arith.truncf %18 : vector<4x256xf32> to vector<4x256xbf16>
    %c8 = arith.constant 8 : index
    %c0_11 = arith.constant 0 : index
    %20 = vector.load %arg9[%c8, %c0_11] : memref<36x512xbf16, #tpu.memory_space<vmem>>, vector<4x256xbf16>
    tpu.vector_store %arg9[%c8, %c0_11], %19 {strides = array<i32>} : memref<36x512xbf16, #tpu.memory_space<vmem>>, vector<4x256xbf16>,
    %c1_i32 = arith.constant 1 : i32
    %21 = tpu.dynamic_rotate %2 by %c1_i32 dim 1 : vector<4x256xf32>, i32 -> vector<4x256xf32>
    %c3 = arith.constant 3 : index
    %c0_12 = arith.constant 0 : index
    %22 = vector.load %arg1[%c3, %c0_12] : memref<9x256xf32, #tpu.memory_space<vmem>>, vector<1x256xf32>
    %23 = vector.broadcast %22 : vector<1x256xf32> to vector<4x256xf32>
    %24 = arith.mulf %21, %23 : vector<4x256xf32>
    %25 = arith.truncf %24 : vector<4x256xf32> to vector<4x256xbf16>
    %c12 = arith.constant 12 : index
    %c0_13 = arith.constant 0 : index
    %26 = vector.load %arg9[%c12, %c0_13] : memref<36x512xbf16, #tpu.memory_space<vmem>>, vector<4x256xbf16>
    tpu.vector_store %arg9[%c12, %c0_13], %25 {strides = array<i32>} : memref<36x512xbf16, #tpu.memory_space<vmem>>, vector<4x256xbf16>,
    %27 = arith.truncf %2 : vector<4x256xf32> to vector<4x256xbf16>
    %c16 = arith.constant 16 : index
    %c0_14 = arith.constant 0 : index
    %28 = vector.load %arg9[%c16, %c0_14] : memref<36x512xbf16, #tpu.memory_space<vmem>>, vector<4x256xbf16>
    tpu.vector_store %arg9[%c16, %c0_14], %27 {strides = array<i32>} : memref<36x512xbf16, #tpu.memory_space<vmem>>, vector<4x256xbf16>,
    %c255_i32 = arith.constant 255 : i32
    %29 = tpu.dynamic_rotate %2 by %c255_i32 dim 1 : vector<4x256xf32>, i32 -> vector<4x256xf32>
    %c5 = arith.constant 5 : index
    %c0_15 = arith.constant 0 : index
    %30 = vector.load %arg1[%c5, %c0_15] : memref<9x256xf32, #tpu.memory_space<vmem>>, vector<1x256xf32>
    %31 = vector.broadcast %30 : vector<1x256xf32> to vector<4x256xf32>
    %32 = arith.mulf %29, %31 : vector<4x256xf32>
    %33 = arith.truncf %32 : vector<4x256xf32> to vector<4x256xbf16>
    %c20 = arith.constant 20 : index
    %c0_16 = arith.constant 0 : index
    %34 = vector.load %arg9[%c20, %c0_16] : memref<36x512xbf16, #tpu.memory_space<vmem>>, vector<4x256xbf16>
    tpu.vector_store %arg9[%c20, %c0_16], %33 {strides = array<i32>} : memref<36x512xbf16, #tpu.memory_space<vmem>>, vector<4x256xbf16>,
    %c241_i32 = arith.constant 241 : i32
    %35 = tpu.dynamic_rotate %2 by %c241_i32 dim 1 : vector<4x256xf32>, i32 -> vector<4x256xf32>
    %c6 = arith.constant 6 : index
    %c0_17 = arith.constant 0 : index
    %36 = vector.load %arg1[%c6, %c0_17] : memref<9x256xf32, #tpu.memory_space<vmem>>, vector<1x256xf32>
    %37 = vector.broadcast %36 : vector<1x256xf32> to vector<4x256xf32>
    %38 = arith.mulf %35, %37 : vector<4x256xf32>
    %39 = arith.truncf %38 : vector<4x256xf32> to vector<4x256xbf16>
    %c24 = arith.constant 24 : index
    %c0_18 = arith.constant 0 : index
    %40 = vector.load %arg9[%c24, %c0_18] : memref<36x512xbf16, #tpu.memory_space<vmem>>, vector<4x256xbf16>
    tpu.vector_store %arg9[%c24, %c0_18], %39 {strides = array<i32>} : memref<36x512xbf16, #tpu.memory_space<vmem>>, vector<4x256xbf16>,
    %c240_i32 = arith.constant 240 : i32
    %41 = tpu.dynamic_rotate %2 by %c240_i32 dim 1 : vector<4x256xf32>, i32 -> vector<4x256xf32>
    %c7 = arith.constant 7 : index
    %c0_19 = arith.constant 0 : index
    %42 = vector.load %arg1[%c7, %c0_19] : memref<9x256xf32, #tpu.memory_space<vmem>>, vector<1x256xf32>
    %43 = vector.broadcast %42 : vector<1x256xf32> to vector<4x256xf32>
    %44 = arith.mulf %41, %43 : vector<4x256xf32>
    %45 = arith.truncf %44 : vector<4x256xf32> to vector<4x256xbf16>
    %c28 = arith.constant 28 : index
    %c0_20 = arith.constant 0 : index
    %46 = vector.load %arg9[%c28, %c0_20] : memref<36x512xbf16, #tpu.memory_space<vmem>>, vector<4x256xbf16>
    tpu.vector_store %arg9[%c28, %c0_20], %45 {strides = array<i32>} : memref<36x512xbf16, #tpu.memory_space<vmem>>, vector<4x256xbf16>,
    %c239_i32 = arith.constant 239 : i32
    %47 = tpu.dynamic_rotate %2 by %c239_i32 dim 1 : vector<4x256xf32>, i32 -> vector<4x256xf32>
    %c8_21 = arith.constant 8 : index
    %c0_22 = arith.constant 0 : index
    %48 = vector.load %arg1[%c8_21, %c0_22] : memref<9x256xf32, #tpu.memory_space<vmem>>, vector<1x256xf32>
    %49 = vector.broadcast %48 : vector<1x256xf32> to vector<4x256xf32>
    %50 = arith.mulf %47, %49 : vector<4x256xf32>
    %51 = arith.truncf %50 : vector<4x256xf32> to vector<4x256xbf16>
    %c32 = arith.constant 32 : index
    %c0_23 = arith.constant 0 : index
    %52 = vector.load %arg9[%c32, %c0_23] : memref<36x512xbf16, #tpu.memory_space<vmem>>, vector<4x256xbf16>
    tpu.vector_store %arg9[%c32, %c0_23], %51 {strides = array<i32>} : memref<36x512xbf16, #tpu.memory_space<vmem>>, vector<4x256xbf16>,
    %c1_24 = arith.constant 1 : index
    %c0_25 = arith.constant 0 : index
    %c0_26 = arith.constant 0 : index
    %53 = vector.load %arg0[%c1_24, %c0_25, %c0_26] : memref<2x4x256xf32, #tpu.memory_space<vmem>>, vector<1x4x256xf32>
    %54 = vector.shape_cast %53 : vector<1x4x256xf32> to vector<4x256xf32>
    %c17_i32_27 = arith.constant 17 : i32
    %55 = tpu.dynamic_rotate %54 by %c17_i32_27 dim 1 : vector<4x256xf32>, i32 -> vector<4x256xf32>
    %c0_28 = arith.constant 0 : index
    %c0_29 = arith.constant 0 : index
    %56 = vector.load %arg1[%c0_28, %c0_29] : memref<9x256xf32, #tpu.memory_space<vmem>>, vector<1x256xf32>
    %57 = vector.broadcast %56 : vector<1x256xf32> to vector<4x256xf32>
    %58 = arith.mulf %55, %57 : vector<4x256xf32>
    %59 = arith.truncf %58 : vector<4x256xf32> to vector<4x256xbf16>
    %c0_30 = arith.constant 0 : index
    %c256 = arith.constant 256 : index
    %60 = vector.load %arg9[%c0_30, %c256] : memref<36x512xbf16, #tpu.memory_space<vmem>>, vector<4x256xbf16>
    tpu.vector_store %arg9[%c0_30, %c256], %59 {strides = array<i32>} : memref<36x512xbf16, #tpu.memory_space<vmem>>, vector<4x256xbf16>,
    %c16_i32_31 = arith.constant 16 : i32
    %61 = tpu.dynamic_rotate %54 by %c16_i32_31 dim 1 : vector<4x256xf32>, i32 -> vector<4x256xf32>
    %c1_32 = arith.constant 1 : index
    %c0_33 = arith.constant 0 : index
    %62 = vector.load %arg1[%c1_32, %c0_33] : memref<9x256xf32, #tpu.memory_space<vmem>>, vector<1x256xf32>
    %63 = vector.broadcast %62 : vector<1x256xf32> to vector<4x256xf32>
    %64 = arith.mulf %61, %63 : vector<4x256xf32>
    %65 = arith.truncf %64 : vector<4x256xf32> to vector<4x256xbf16>
    %c4_34 = arith.constant 4 : index
    %c256_35 = arith.constant 256 : index
    %66 = vector.load %arg9[%c4_34, %c256_35] : memref<36x512xbf16, #tpu.memory_space<vmem>>, vector<4x256xbf16>
    tpu.vector_store %arg9[%c4_34, %c256_35], %65 {strides = array<i32>} : memref<36x512xbf16, #tpu.memory_space<vmem>>, vector<4x256xbf16>,
    %c15_i32_36 = arith.constant 15 : i32
    %67 = tpu.dynamic_rotate %54 by %c15_i32_36 dim 1 : vector<4x256xf32>, i32 -> vector<4x256xf32>
    %c2_37 = arith.constant 2 : index
    %c0_38 = arith.constant 0 : index
    %68 = vector.load %arg1[%c2_37, %c0_38] : memref<9x256xf32, #tpu.memory_space<vmem>>, vector<1x256xf32>
    %69 = vector.broadcast %68 : vector<1x256xf32> to vector<4x256xf32>
    %70 = arith.mulf %67, %69 : vector<4x256xf32>
    %71 = arith.truncf %70 : vector<4x256xf32> to vector<4x256xbf16>
    %c8_39 = arith.constant 8 : index
    %c256_40 = arith.constant 256 : index
    %72 = vector.load %arg9[%c8_39, %c256_40] : memref<36x512xbf16, #tpu.memory_space<vmem>>, vector<4x256xbf16>
    tpu.vector_store %arg9[%c8_39, %c256_40], %71 {strides = array<i32>} : memref<36x512xbf16, #tpu.memory_space<vmem>>, vector<4x256xbf16>,
    %c1_i32_41 = arith.constant 1 : i32
    %73 = tpu.dynamic_rotate %54 by %c1_i32_41 dim 1 : vector<4x256xf32>, i32 -> vector<4x256xf32>
    %c3_42 = arith.constant 3 : index
    %c0_43 = arith.constant 0 : index
    %74 = vector.load %arg1[%c3_42, %c0_43] : memref<9x256xf32, #tpu.memory_space<vmem>>, vector<1x256xf32>
    %75 = vector.broadcast %74 : vector<1x256xf32> to vector<4x256xf32>
    %76 = arith.mulf %73, %75 : vector<4x256xf32>
    %77 = arith.truncf %76 : vector<4x256xf32> to vector<4x256xbf16>
    %c12_44 = arith.constant 12 : index
    %c256_45 = arith.constant 256 : index
    %78 = vector.load %arg9[%c12_44, %c256_45] : memref<36x512xbf16, #tpu.memory_space<vmem>>, vector<4x256xbf16>
    tpu.vector_store %arg9[%c12_44, %c256_45], %77 {strides = array<i32>} : memref<36x512xbf16, #tpu.memory_space<vmem>>, vector<4x256xbf16>,
    %79 = arith.truncf %54 : vector<4x256xf32> to vector<4x256xbf16>
    %c16_46 = arith.constant 16 : index
    %c256_47 = arith.constant 256 : index
    %80 = vector.load %arg9[%c16_46, %c256_47] : memref<36x512xbf16, #tpu.memory_space<vmem>>, vector<4x256xbf16>
    tpu.vector_store %arg9[%c16_46, %c256_47], %79 {strides = array<i32>} : memref<36x512xbf16, #tpu.memory_space<vmem>>, vector<4x256xbf16>,
    %c255_i32_48 = arith.constant 255 : i32
    %81 = tpu.dynamic_rotate %54 by %c255_i32_48 dim 1 : vector<4x256xf32>, i32 -> vector<4x256xf32>
    %c5_49 = arith.constant 5 : index
    %c0_50 = arith.constant 0 : index
    %82 = vector.load %arg1[%c5_49, %c0_50] : memref<9x256xf32, #tpu.memory_space<vmem>>, vector<1x256xf32>
    %83 = vector.broadcast %82 : vector<1x256xf32> to vector<4x256xf32>
    %84 = arith.mulf %81, %83 : vector<4x256xf32>
    %85 = arith.truncf %84 : vector<4x256xf32> to vector<4x256xbf16>
    %c20_51 = arith.constant 20 : index
    %c256_52 = arith.constant 256 : index
    %86 = vector.load %arg9[%c20_51, %c256_52] : memref<36x512xbf16, #tpu.memory_space<vmem>>, vector<4x256xbf16>
    tpu.vector_store %arg9[%c20_51, %c256_52], %85 {strides = array<i32>} : memref<36x512xbf16, #tpu.memory_space<vmem>>, vector<4x256xbf16>,
    %c241_i32_53 = arith.constant 241 : i32
    %87 = tpu.dynamic_rotate %54 by %c241_i32_53 dim 1 : vector<4x256xf32>, i32 -> vector<4x256xf32>
    %c6_54 = arith.constant 6 : index
    %c0_55 = arith.constant 0 : index
    %88 = vector.load %arg1[%c6_54, %c0_55] : memref<9x256xf32, #tpu.memory_space<vmem>>, vector<1x256xf32>
    %89 = vector.broadcast %88 : vector<1x256xf32> to vector<4x256xf32>
    %90 = arith.mulf %87, %89 : vector<4x256xf32>
    %91 = arith.truncf %90 : vector<4x256xf32> to vector<4x256xbf16>
    %c24_56 = arith.constant 24 : index
    %c256_57 = arith.constant 256 : index
    %92 = vector.load %arg9[%c24_56, %c256_57] : memref<36x512xbf16, #tpu.memory_space<vmem>>, vector<4x256xbf16>
    tpu.vector_store %arg9[%c24_56, %c256_57], %91 {strides = array<i32>} : memref<36x512xbf16, #tpu.memory_space<vmem>>, vector<4x256xbf16>,
    %c240_i32_58 = arith.constant 240 : i32
    %93 = tpu.dynamic_rotate %54 by %c240_i32_58 dim 1 : vector<4x256xf32>, i32 -> vector<4x256xf32>
    %c7_59 = arith.constant 7 : index
    %c0_60 = arith.constant 0 : index
    %94 = vector.load %arg1[%c7_59, %c0_60] : memref<9x256xf32, #tpu.memory_space<vmem>>, vector<1x256xf32>
    %95 = vector.broadcast %94 : vector<1x256xf32> to vector<4x256xf32>
    %96 = arith.mulf %93, %95 : vector<4x256xf32>
    %97 = arith.truncf %96 : vector<4x256xf32> to vector<4x256xbf16>
    %c28_61 = arith.constant 28 : index
    %c256_62 = arith.constant 256 : index
    %98 = vector.load %arg9[%c28_61, %c256_62] : memref<36x512xbf16, #tpu.memory_space<vmem>>, vector<4x256xbf16>
    tpu.vector_store %arg9[%c28_61, %c256_62], %97 {strides = array<i32>} : memref<36x512xbf16, #tpu.memory_space<vmem>>, vector<4x256xbf16>,
    %c239_i32_63 = arith.constant 239 : i32
    %99 = tpu.dynamic_rotate %54 by %c239_i32_63 dim 1 : vector<4x256xf32>, i32 -> vector<4x256xf32>
    %c8_64 = arith.constant 8 : index
    %c0_65 = arith.constant 0 : index
    %100 = vector.load %arg1[%c8_64, %c0_65] : memref<9x256xf32, #tpu.memory_space<vmem>>, vector<1x256xf32>
    %101 = vector.broadcast %100 : vector<1x256xf32> to vector<4x256xf32>
    %102 = arith.mulf %99, %101 : vector<4x256xf32>
    %103 = arith.truncf %102 : vector<4x256xf32> to vector<4x256xbf16>
    %c32_66 = arith.constant 32 : index
    %c256_67 = arith.constant 256 : index
    %104 = vector.load %arg9[%c32_66, %c256_67] : memref<36x512xbf16, #tpu.memory_space<vmem>>, vector<4x256xbf16>
    tpu.vector_store %arg9[%c32_66, %c256_67], %103 {strides = array<i32>} : memref<36x512xbf16, #tpu.memory_space<vmem>>, vector<4x256xbf16>,
    %c0_68 = arith.constant 0 : index
    %c0_69 = arith.constant 0 : index
    %105 = vector.load %arg9[%c0_68, %c0_69] : memref<36x512xbf16, #tpu.memory_space<vmem>>, vector<36x512xbf16>
    %cst = arith.constant dense<0.000000e+00> : vector<4x512xf32>
    %106 = tpu.matmul %0, %105, %cst {dimension_numbers = #tpu.dot_dimension_numbers<[1], [0], [0], [1], [0, 0, 1, 1], [], []>} : vector<4x36xbf16>, vector<36x512xbf16>, vector<4x512xf32> -> vector<4x512xf32>
    %cst_70 = arith.constant dense<0.000000e+00> : vector<4xf32>
    %107 = vector.multi_reduction <add>, %106, %cst_70 [1] : vector<4x512xf32> to vector<4xf32>
    %108 = vector.shape_cast %107 : vector<4xf32> to vector<4x1xf32>
    %109 = arith.mulf %106, %106 : vector<4x512xf32>
    %cst_71 = arith.constant dense<0.000000e+00> : vector<4xf32>
    %110 = vector.multi_reduction <add>, %109, %cst_71 [1] : vector<4x512xf32> to vector<4xf32>
    %111 = vector.shape_cast %110 : vector<4xf32> to vector<4x1xf32>
    %cst_72 = arith.constant 0.001953125 : f32
    %112 = vector.broadcast %cst_72 : f32 to vector<4x1xf32>
    %113 = arith.mulf %108, %112 : vector<4x1xf32>
    %cst_73 = arith.constant 0.001953125 : f32
    %114 = vector.broadcast %cst_73 : f32 to vector<4x1xf32>
    %115 = arith.mulf %111, %114 : vector<4x1xf32>
    %116 = arith.mulf %113, %113 : vector<4x1xf32>
    %117 = arith.subf %115, %116 : vector<4x1xf32>
    %cst_74 = arith.constant 0.000000e+00 : f32
    %118 = vector.broadcast %cst_74 : f32 to vector<4x1xf32>
    %119 = arith.maximumf %117, %118 : vector<4x1xf32>
    %c0_75 = arith.constant 0 : index
    %c0_76 = arith.constant 0 : index
    %120 = vector.load %arg3[%c0_75, %c0_76] : memref<4x1xf32, #tpu.memory_space<vmem>>, vector<4x1xf32>
    %cst_77 = arith.constant 9.99999974E-6 : f32
    %121 = vector.broadcast %cst_77 : f32 to vector<4x1xf32>
    %122 = arith.addf %119, %121 : vector<4x1xf32>
    %123 = math.rsqrt %122 : vector<4x1xf32>
    %124 = arith.mulf %120, %123 : vector<4x1xf32>
    %125 = vector.broadcast %124 : vector<4x1xf32> to vector<4x512xf32>
    %126 = arith.mulf %106, %125 : vector<4x512xf32>
    %c0_78 = arith.constant 0 : index
    %c0_79 = arith.constant 0 : index
    %127 = vector.load %arg4[%c0_78, %c0_79] : memref<4x1xf32, #tpu.memory_space<vmem>>, vector<4x1xf32>
    %128 = arith.mulf %113, %124 : vector<4x1xf32>
    %129 = arith.subf %127, %128 : vector<4x1xf32>
    %130 = vector.broadcast %129 : vector<4x1xf32> to vector<4x512xf32>
    %131 = arith.addf %126, %130 : vector<4x512xf32>
    %cst_80 = arith.constant 0.000000e+00 : f32
    %132 = vector.broadcast %cst_80 : f32 to vector<4x512xf32>
    %133 = arith.maximumf %131, %132 : vector<4x512xf32>
    %c0_81 = arith.constant 0 : index
    %c0_82 = arith.constant 0 : index
    %134 = vector.load %arg5[%c0_81, %c0_82] : memref<4x36xbf16, #tpu.memory_space<vmem>>, vector<4x36xbf16>
    %135 = vector.extract_strided_slice %133 {offsets = [0, 0], sizes = [4, 256], strides = [1, 1]} : vector<4x512xf32> to vector<4x256xf32>
    %c17_i32_83 = arith.constant 17 : i32
    %136 = tpu.dynamic_rotate %135 by %c17_i32_83 dim 1 : vector<4x256xf32>, i32 -> vector<4x256xf32>
    %c0_84 = arith.constant 0 : index
    %c0_85 = arith.constant 0 : index
    %137 = vector.load %arg1[%c0_84, %c0_85] : memref<9x256xf32, #tpu.memory_space<vmem>>, vector<1x256xf32>
    %138 = vector.broadcast %137 : vector<1x256xf32> to vector<4x256xf32>
    %139 = arith.mulf %136, %138 : vector<4x256xf32>
    %140 = arith.truncf %139 : vector<4x256xf32> to vector<4x256xbf16>
    %c0_86 = arith.constant 0 : index
    %c0_87 = arith.constant 0 : index
    %141 = vector.load %arg9[%c0_86, %c0_87] : memref<36x512xbf16, #tpu.memory_space<vmem>>, vector<4x256xbf16>
    tpu.vector_store %arg9[%c0_86, %c0_87], %140 {strides = array<i32>} : memref<36x512xbf16, #tpu.memory_space<vmem>>, vector<4x256xbf16>,
    %c16_i32_88 = arith.constant 16 : i32
    %142 = tpu.dynamic_rotate %135 by %c16_i32_88 dim 1 : vector<4x256xf32>, i32 -> vector<4x256xf32>
    %c1_89 = arith.constant 1 : index
    %c0_90 = arith.constant 0 : index
    %143 = vector.load %arg1[%c1_89, %c0_90] : memref<9x256xf32, #tpu.memory_space<vmem>>, vector<1x256xf32>
    %144 = vector.broadcast %143 : vector<1x256xf32> to vector<4x256xf32>
    %145 = arith.mulf %142, %144 : vector<4x256xf32>
    %146 = arith.truncf %145 : vector<4x256xf32> to vector<4x256xbf16>
    %c4_91 = arith.constant 4 : index
    %c0_92 = arith.constant 0 : index
    %147 = vector.load %arg9[%c4_91, %c0_92] : memref<36x512xbf16, #tpu.memory_space<vmem>>, vector<4x256xbf16>
    tpu.vector_store %arg9[%c4_91, %c0_92], %146 {strides = array<i32>} : memref<36x512xbf16, #tpu.memory_space<vmem>>, vector<4x256xbf16>,
    %c15_i32_93 = arith.constant 15 : i32
    %148 = tpu.dynamic_rotate %135 by %c15_i32_93 dim 1 : vector<4x256xf32>, i32 -> vector<4x256xf32>
    %c2_94 = arith.constant 2 : index
    %c0_95 = arith.constant 0 : index
    %149 = vector.load %arg1[%c2_94, %c0_95] : memref<9x256xf32, #tpu.memory_space<vmem>>, vector<1x256xf32>
    %150 = vector.broadcast %149 : vector<1x256xf32> to vector<4x256xf32>
    %151 = arith.mulf %148, %150 : vector<4x256xf32>
    %152 = arith.truncf %151 : vector<4x256xf32> to vector<4x256xbf16>
    %c8_96 = arith.constant 8 : index
    %c0_97 = arith.constant 0 : index
    %153 = vector.load %arg9[%c8_96, %c0_97] : memref<36x512xbf16, #tpu.memory_space<vmem>>, vector<4x256xbf16>
    tpu.vector_store %arg9[%c8_96, %c0_97], %152 {strides = array<i32>} : memref<36x512xbf16, #tpu.memory_space<vmem>>, vector<4x256xbf16>,
    %c1_i32_98 = arith.constant 1 : i32
    %154 = tpu.dynamic_rotate %135 by %c1_i32_98 dim 1 : vector<4x256xf32>, i32 -> vector<4x256xf32>
    %c3_99 = arith.constant 3 : index
    %c0_100 = arith.constant 0 : index
    %155 = vector.load %arg1[%c3_99, %c0_100] : memref<9x256xf32, #tpu.memory_space<vmem>>, vector<1x256xf32>
    %156 = vector.broadcast %155 : vector<1x256xf32> to vector<4x256xf32>
    %157 = arith.mulf %154, %156 : vector<4x256xf32>
    %158 = arith.truncf %157 : vector<4x256xf32> to vector<4x256xbf16>
    %c12_101 = arith.constant 12 : index
    %c0_102 = arith.constant 0 : index
    %159 = vector.load %arg9[%c12_101, %c0_102] : memref<36x512xbf16, #tpu.memory_space<vmem>>, vector<4x256xbf16>
    tpu.vector_store %arg9[%c12_101, %c0_102], %158 {strides = array<i32>} : memref<36x512xbf16, #tpu.memory_space<vmem>>, vector<4x256xbf16>,
    %160 = arith.truncf %135 : vector<4x256xf32> to vector<4x256xbf16>
    %c16_103 = arith.constant 16 : index
    %c0_104 = arith.constant 0 : index
    %161 = vector.load %arg9[%c16_103, %c0_104] : memref<36x512xbf16, #tpu.memory_space<vmem>>, vector<4x256xbf16>
    tpu.vector_store %arg9[%c16_103, %c0_104], %160 {strides = array<i32>} : memref<36x512xbf16, #tpu.memory_space<vmem>>, vector<4x256xbf16>,
    %c255_i32_105 = arith.constant 255 : i32
    %162 = tpu.dynamic_rotate %135 by %c255_i32_105 dim 1 : vector<4x256xf32>, i32 -> vector<4x256xf32>
    %c5_106 = arith.constant 5 : index
    %c0_107 = arith.constant 0 : index
    %163 = vector.load %arg1[%c5_106, %c0_107] : memref<9x256xf32, #tpu.memory_space<vmem>>, vector<1x256xf32>
    %164 = vector.broadcast %163 : vector<1x256xf32> to vector<4x256xf32>
    %165 = arith.mulf %162, %164 : vector<4x256xf32>
    %166 = arith.truncf %165 : vector<4x256xf32> to vector<4x256xbf16>
    %c20_108 = arith.constant 20 : index
    %c0_109 = arith.constant 0 : index
    %167 = vector.load %arg9[%c20_108, %c0_109] : memref<36x512xbf16, #tpu.memory_space<vmem>>, vector<4x256xbf16>
    tpu.vector_store %arg9[%c20_108, %c0_109], %166 {strides = array<i32>} : memref<36x512xbf16, #tpu.memory_space<vmem>>, vector<4x256xbf16>,
    %c241_i32_110 = arith.constant 241 : i32
    %168 = tpu.dynamic_rotate %135 by %c241_i32_110 dim 1 : vector<4x256xf32>, i32 -> vector<4x256xf32>
    %c6_111 = arith.constant 6 : index
    %c0_112 = arith.constant 0 : index
    %169 = vector.load %arg1[%c6_111, %c0_112] : memref<9x256xf32, #tpu.memory_space<vmem>>, vector<1x256xf32>
    %170 = vector.broadcast %169 : vector<1x256xf32> to vector<4x256xf32>
    %171 = arith.mulf %168, %170 : vector<4x256xf32>
    %172 = arith.truncf %171 : vector<4x256xf32> to vector<4x256xbf16>
    %c24_113 = arith.constant 24 : index
    %c0_114 = arith.constant 0 : index
    %173 = vector.load %arg9[%c24_113, %c0_114] : memref<36x512xbf16, #tpu.memory_space<vmem>>, vector<4x256xbf16>
    tpu.vector_store %arg9[%c24_113, %c0_114], %172 {strides = array<i32>} : memref<36x512xbf16, #tpu.memory_space<vmem>>, vector<4x256xbf16>,
    %c240_i32_115 = arith.constant 240 : i32
    %174 = tpu.dynamic_rotate %135 by %c240_i32_115 dim 1 : vector<4x256xf32>, i32 -> vector<4x256xf32>
    %c7_116 = arith.constant 7 : index
    %c0_117 = arith.constant 0 : index
    %175 = vector.load %arg1[%c7_116, %c0_117] : memref<9x256xf32, #tpu.memory_space<vmem>>, vector<1x256xf32>
    %176 = vector.broadcast %175 : vector<1x256xf32> to vector<4x256xf32>
    %177 = arith.mulf %174, %176 : vector<4x256xf32>
    %178 = arith.truncf %177 : vector<4x256xf32> to vector<4x256xbf16>
    %c28_118 = arith.constant 28 : index
    %c0_119 = arith.constant 0 : index
    %179 = vector.load %arg9[%c28_118, %c0_119] : memref<36x512xbf16, #tpu.memory_space<vmem>>, vector<4x256xbf16>
    tpu.vector_store %arg9[%c28_118, %c0_119], %178 {strides = array<i32>} : memref<36x512xbf16, #tpu.memory_space<vmem>>, vector<4x256xbf16>,
    %c239_i32_120 = arith.constant 239 : i32
    %180 = tpu.dynamic_rotate %135 by %c239_i32_120 dim 1 : vector<4x256xf32>, i32 -> vector<4x256xf32>
    %c8_121 = arith.constant 8 : index
    %c0_122 = arith.constant 0 : index
    %181 = vector.load %arg1[%c8_121, %c0_122] : memref<9x256xf32, #tpu.memory_space<vmem>>, vector<1x256xf32>
    %182 = vector.broadcast %181 : vector<1x256xf32> to vector<4x256xf32>
    %183 = arith.mulf %180, %182 : vector<4x256xf32>
    %184 = arith.truncf %183 : vector<4x256xf32> to vector<4x256xbf16>
    %c32_123 = arith.constant 32 : index
    %c0_124 = arith.constant 0 : index
    %185 = vector.load %arg9[%c32_123, %c0_124] : memref<36x512xbf16, #tpu.memory_space<vmem>>, vector<4x256xbf16>
    tpu.vector_store %arg9[%c32_123, %c0_124], %184 {strides = array<i32>} : memref<36x512xbf16, #tpu.memory_space<vmem>>, vector<4x256xbf16>,
    %186 = vector.extract_strided_slice %133 {offsets = [0, 256], sizes = [4, 256], strides = [1, 1]} : vector<4x512xf32> to vector<4x256xf32>
    %c17_i32_125 = arith.constant 17 : i32
    %187 = tpu.dynamic_rotate %186 by %c17_i32_125 dim 1 : vector<4x256xf32>, i32 -> vector<4x256xf32>
    %c0_126 = arith.constant 0 : index
    %c0_127 = arith.constant 0 : index
    %188 = vector.load %arg1[%c0_126, %c0_127] : memref<9x256xf32, #tpu.memory_space<vmem>>, vector<1x256xf32>
    %189 = vector.broadcast %188 : vector<1x256xf32> to vector<4x256xf32>
    %190 = arith.mulf %187, %189 : vector<4x256xf32>
    %191 = arith.truncf %190 : vector<4x256xf32> to vector<4x256xbf16>
    %c0_128 = arith.constant 0 : index
    %c256_129 = arith.constant 256 : index
    %192 = vector.load %arg9[%c0_128, %c256_129] : memref<36x512xbf16, #tpu.memory_space<vmem>>, vector<4x256xbf16>
    tpu.vector_store %arg9[%c0_128, %c256_129], %191 {strides = array<i32>} : memref<36x512xbf16, #tpu.memory_space<vmem>>, vector<4x256xbf16>,
    %c16_i32_130 = arith.constant 16 : i32
    %193 = tpu.dynamic_rotate %186 by %c16_i32_130 dim 1 : vector<4x256xf32>, i32 -> vector<4x256xf32>
    %c1_131 = arith.constant 1 : index
    %c0_132 = arith.constant 0 : index
    %194 = vector.load %arg1[%c1_131, %c0_132] : memref<9x256xf32, #tpu.memory_space<vmem>>, vector<1x256xf32>
    %195 = vector.broadcast %194 : vector<1x256xf32> to vector<4x256xf32>
    %196 = arith.mulf %193, %195 : vector<4x256xf32>
    %197 = arith.truncf %196 : vector<4x256xf32> to vector<4x256xbf16>
    %c4_133 = arith.constant 4 : index
    %c256_134 = arith.constant 256 : index
    %198 = vector.load %arg9[%c4_133, %c256_134] : memref<36x512xbf16, #tpu.memory_space<vmem>>, vector<4x256xbf16>
    tpu.vector_store %arg9[%c4_133, %c256_134], %197 {strides = array<i32>} : memref<36x512xbf16, #tpu.memory_space<vmem>>, vector<4x256xbf16>,
    %c15_i32_135 = arith.constant 15 : i32
    %199 = tpu.dynamic_rotate %186 by %c15_i32_135 dim 1 : vector<4x256xf32>, i32 -> vector<4x256xf32>
    %c2_136 = arith.constant 2 : index
    %c0_137 = arith.constant 0 : index
    %200 = vector.load %arg1[%c2_136, %c0_137] : memref<9x256xf32, #tpu.memory_space<vmem>>, vector<1x256xf32>
    %201 = vector.broadcast %200 : vector<1x256xf32> to vector<4x256xf32>
    %202 = arith.mulf %199, %201 : vector<4x256xf32>
    %203 = arith.truncf %202 : vector<4x256xf32> to vector<4x256xbf16>
    %c8_138 = arith.constant 8 : index
    %c256_139 = arith.constant 256 : index
    %204 = vector.load %arg9[%c8_138, %c256_139] : memref<36x512xbf16, #tpu.memory_space<vmem>>, vector<4x256xbf16>
    tpu.vector_store %arg9[%c8_138, %c256_139], %203 {strides = array<i32>} : memref<36x512xbf16, #tpu.memory_space<vmem>>, vector<4x256xbf16>,
    %c1_i32_140 = arith.constant 1 : i32
    %205 = tpu.dynamic_rotate %186 by %c1_i32_140 dim 1 : vector<4x256xf32>, i32 -> vector<4x256xf32>
    %c3_141 = arith.constant 3 : index
    %c0_142 = arith.constant 0 : index
    %206 = vector.load %arg1[%c3_141, %c0_142] : memref<9x256xf32, #tpu.memory_space<vmem>>, vector<1x256xf32>
    %207 = vector.broadcast %206 : vector<1x256xf32> to vector<4x256xf32>
    %208 = arith.mulf %205, %207 : vector<4x256xf32>
    %209 = arith.truncf %208 : vector<4x256xf32> to vector<4x256xbf16>
    %c12_143 = arith.constant 12 : index
    %c256_144 = arith.constant 256 : index
    %210 = vector.load %arg9[%c12_143, %c256_144] : memref<36x512xbf16, #tpu.memory_space<vmem>>, vector<4x256xbf16>
    tpu.vector_store %arg9[%c12_143, %c256_144], %209 {strides = array<i32>} : memref<36x512xbf16, #tpu.memory_space<vmem>>, vector<4x256xbf16>,
    %211 = arith.truncf %186 : vector<4x256xf32> to vector<4x256xbf16>
    %c16_145 = arith.constant 16 : index
    %c256_146 = arith.constant 256 : index
    %212 = vector.load %arg9[%c16_145, %c256_146] : memref<36x512xbf16, #tpu.memory_space<vmem>>, vector<4x256xbf16>
    tpu.vector_store %arg9[%c16_145, %c256_146], %211 {strides = array<i32>} : memref<36x512xbf16, #tpu.memory_space<vmem>>, vector<4x256xbf16>,
    %c255_i32_147 = arith.constant 255 : i32
    %213 = tpu.dynamic_rotate %186 by %c255_i32_147 dim 1 : vector<4x256xf32>, i32 -> vector<4x256xf32>
    %c5_148 = arith.constant 5 : index
    %c0_149 = arith.constant 0 : index
    %214 = vector.load %arg1[%c5_148, %c0_149] : memref<9x256xf32, #tpu.memory_space<vmem>>, vector<1x256xf32>
    %215 = vector.broadcast %214 : vector<1x256xf32> to vector<4x256xf32>
    %216 = arith.mulf %213, %215 : vector<4x256xf32>
    %217 = arith.truncf %216 : vector<4x256xf32> to vector<4x256xbf16>
    %c20_150 = arith.constant 20 : index
    %c256_151 = arith.constant 256 : index
    %218 = vector.load %arg9[%c20_150, %c256_151] : memref<36x512xbf16, #tpu.memory_space<vmem>>, vector<4x256xbf16>
    tpu.vector_store %arg9[%c20_150, %c256_151], %217 {strides = array<i32>} : memref<36x512xbf16, #tpu.memory_space<vmem>>, vector<4x256xbf16>,
    %c241_i32_152 = arith.constant 241 : i32
    %219 = tpu.dynamic_rotate %186 by %c241_i32_152 dim 1 : vector<4x256xf32>, i32 -> vector<4x256xf32>
    %c6_153 = arith.constant 6 : index
    %c0_154 = arith.constant 0 : index
    %220 = vector.load %arg1[%c6_153, %c0_154] : memref<9x256xf32, #tpu.memory_space<vmem>>, vector<1x256xf32>
    %221 = vector.broadcast %220 : vector<1x256xf32> to vector<4x256xf32>
    %222 = arith.mulf %219, %221 : vector<4x256xf32>
    %223 = arith.truncf %222 : vector<4x256xf32> to vector<4x256xbf16>
    %c24_155 = arith.constant 24 : index
    %c256_156 = arith.constant 256 : index
    %224 = vector.load %arg9[%c24_155, %c256_156] : memref<36x512xbf16, #tpu.memory_space<vmem>>, vector<4x256xbf16>
    tpu.vector_store %arg9[%c24_155, %c256_156], %223 {strides = array<i32>} : memref<36x512xbf16, #tpu.memory_space<vmem>>, vector<4x256xbf16>,
    %c240_i32_157 = arith.constant 240 : i32
    %225 = tpu.dynamic_rotate %186 by %c240_i32_157 dim 1 : vector<4x256xf32>, i32 -> vector<4x256xf32>
    %c7_158 = arith.constant 7 : index
    %c0_159 = arith.constant 0 : index
    %226 = vector.load %arg1[%c7_158, %c0_159] : memref<9x256xf32, #tpu.memory_space<vmem>>, vector<1x256xf32>
    %227 = vector.broadcast %226 : vector<1x256xf32> to vector<4x256xf32>
    %228 = arith.mulf %225, %227 : vector<4x256xf32>
    %229 = arith.truncf %228 : vector<4x256xf32> to vector<4x256xbf16>
    %c28_160 = arith.constant 28 : index
    %c256_161 = arith.constant 256 : index
    %230 = vector.load %arg9[%c28_160, %c256_161] : memref<36x512xbf16, #tpu.memory_space<vmem>>, vector<4x256xbf16>
    tpu.vector_store %arg9[%c28_160, %c256_161], %229 {strides = array<i32>} : memref<36x512xbf16, #tpu.memory_space<vmem>>, vector<4x256xbf16>,
    %c239_i32_162 = arith.constant 239 : i32
    %231 = tpu.dynamic_rotate %186 by %c239_i32_162 dim 1 : vector<4x256xf32>, i32 -> vector<4x256xf32>
    %c8_163 = arith.constant 8 : index
    %c0_164 = arith.constant 0 : index
    %232 = vector.load %arg1[%c8_163, %c0_164] : memref<9x256xf32, #tpu.memory_space<vmem>>, vector<1x256xf32>
    %233 = vector.broadcast %232 : vector<1x256xf32> to vector<4x256xf32>
    %234 = arith.mulf %231, %233 : vector<4x256xf32>
    %235 = arith.truncf %234 : vector<4x256xf32> to vector<4x256xbf16>
    %c32_165 = arith.constant 32 : index
    %c256_166 = arith.constant 256 : index
    %236 = vector.load %arg9[%c32_165, %c256_166] : memref<36x512xbf16, #tpu.memory_space<vmem>>, vector<4x256xbf16>
    tpu.vector_store %arg9[%c32_165, %c256_166], %235 {strides = array<i32>} : memref<36x512xbf16, #tpu.memory_space<vmem>>, vector<4x256xbf16>,
    %c0_167 = arith.constant 0 : index
    %c0_168 = arith.constant 0 : index
    %237 = vector.load %arg9[%c0_167, %c0_168] : memref<36x512xbf16, #tpu.memory_space<vmem>>, vector<36x512xbf16>
    %cst_169 = arith.constant dense<0.000000e+00> : vector<4x512xf32>
    %238 = tpu.matmul %134, %237, %cst_169 {dimension_numbers = #tpu.dot_dimension_numbers<[1], [0], [0], [1], [0, 0, 1, 1], [], []>} : vector<4x36xbf16>, vector<36x512xbf16>, vector<4x512xf32> -> vector<4x512xf32>
    %cst_170 = arith.constant dense<0.000000e+00> : vector<4xf32>
    %239 = vector.multi_reduction <add>, %238, %cst_170 [1] : vector<4x512xf32> to vector<4xf32>
    %240 = vector.shape_cast %239 : vector<4xf32> to vector<4x1xf32>
    %241 = arith.mulf %238, %238 : vector<4x512xf32>
    %cst_171 = arith.constant dense<0.000000e+00> : vector<4xf32>
    %242 = vector.multi_reduction <add>, %241, %cst_171 [1] : vector<4x512xf32> to vector<4xf32>
    %243 = vector.shape_cast %242 : vector<4xf32> to vector<4x1xf32>
    %cst_172 = arith.constant 0.001953125 : f32
    %244 = vector.broadcast %cst_172 : f32 to vector<4x1xf32>
    %245 = arith.mulf %240, %244 : vector<4x1xf32>
    %cst_173 = arith.constant 0.001953125 : f32
    %246 = vector.broadcast %cst_173 : f32 to vector<4x1xf32>
    %247 = arith.mulf %243, %246 : vector<4x1xf32>
    %248 = arith.mulf %245, %245 : vector<4x1xf32>
    %249 = arith.subf %247, %248 : vector<4x1xf32>
    %cst_174 = arith.constant 0.000000e+00 : f32
    %250 = vector.broadcast %cst_174 : f32 to vector<4x1xf32>
    %251 = arith.maximumf %249, %250 : vector<4x1xf32>
    %c0_175 = arith.constant 0 : index
    %c0_176 = arith.constant 0 : index
    %252 = vector.load %arg6[%c0_175, %c0_176] : memref<4x1xf32, #tpu.memory_space<vmem>>, vector<4x1xf32>
    %cst_177 = arith.constant 9.99999974E-6 : f32
    %253 = vector.broadcast %cst_177 : f32 to vector<4x1xf32>
    %254 = arith.addf %251, %253 : vector<4x1xf32>
    %255 = math.rsqrt %254 : vector<4x1xf32>
    %256 = arith.mulf %252, %255 : vector<4x1xf32>
    %257 = vector.broadcast %256 : vector<4x1xf32> to vector<4x512xf32>
    %258 = arith.mulf %238, %257 : vector<4x512xf32>
    %c0_178 = arith.constant 0 : index
    %c0_179 = arith.constant 0 : index
    %259 = vector.load %arg7[%c0_178, %c0_179] : memref<4x1xf32, #tpu.memory_space<vmem>>, vector<4x1xf32>
    %260 = arith.mulf %245, %256 : vector<4x1xf32>
    %261 = arith.subf %259, %260 : vector<4x1xf32>
    %262 = vector.broadcast %261 : vector<4x1xf32> to vector<4x512xf32>
    %263 = arith.addf %258, %262 : vector<4x512xf32>
    %264 = vector.extract_strided_slice %263 {offsets = [0, 0], sizes = [4, 256], strides = [1, 1]} : vector<4x512xf32> to vector<4x256xf32>
    %c0_180 = arith.constant 0 : index
    %c0_181 = arith.constant 0 : index
    %c0_182 = arith.constant 0 : index
    %265 = vector.load %arg0[%c0_180, %c0_181, %c0_182] : memref<2x4x256xf32, #tpu.memory_space<vmem>>, vector<1x4x256xf32>
    %266 = vector.shape_cast %265 : vector<1x4x256xf32> to vector<4x256xf32>
    %267 = arith.addf %264, %266 : vector<4x256xf32>
    %cst_183 = arith.constant 0.000000e+00 : f32
    %268 = vector.broadcast %cst_183 : f32 to vector<4x256xf32>
    %269 = arith.maximumf %267, %268 : vector<4x256xf32>
    %c0_184 = arith.constant 0 : index
    %c0_185 = arith.constant 0 : index
    %c0_186 = arith.constant 0 : index
    %270 = vector.load %arg8[%c0_184, %c0_185, %c0_186] : memref<2x4x256xf32, #tpu.memory_space<vmem>>, vector<1x4x256xf32>
    %271 = vector.shape_cast %270 : vector<1x4x256xf32> to vector<4x256xf32>
    %272 = vector.shape_cast %269 : vector<4x256xf32> to vector<1x4x256xf32>
    tpu.vector_store %arg8[%c0_184, %c0_185, %c0_186], %272 {strides = array<i32>} : memref<2x4x256xf32, #tpu.memory_space<vmem>>, vector<1x4x256xf32>,
    %273 = vector.extract_strided_slice %263 {offsets = [0, 256], sizes = [4, 256], strides = [1, 1]} : vector<4x512xf32> to vector<4x256xf32>
    %c1_187 = arith.constant 1 : index
    %c0_188 = arith.constant 0 : index
    %c0_189 = arith.constant 0 : index
    %274 = vector.load %arg0[%c1_187, %c0_188, %c0_189] : memref<2x4x256xf32, #tpu.memory_space<vmem>>, vector<1x4x256xf32>
    %275 = vector.shape_cast %274 : vector<1x4x256xf32> to vector<4x256xf32>
    %276 = arith.addf %273, %275 : vector<4x256xf32>
    %cst_190 = arith.constant 0.000000e+00 : f32
    %277 = vector.broadcast %cst_190 : f32 to vector<4x256xf32>
    %278 = arith.maximumf %276, %277 : vector<4x256xf32>
    %c1_191 = arith.constant 1 : index
    %c0_192 = arith.constant 0 : index
    %c0_193 = arith.constant 0 : index
    %279 = vector.load %arg8[%c1_191, %c0_192, %c0_193] : memref<2x4x256xf32, #tpu.memory_space<vmem>>, vector<1x4x256xf32>
    %280 = vector.shape_cast %279 : vector<1x4x256xf32> to vector<4x256xf32>
    %281 = vector.shape_cast %278 : vector<4x256xf32> to vector<1x4x256xf32>
    tpu.vector_store %arg8[%c1_191, %c0_192, %c0_193], %281 {strides = array<i32>} : memref<2x4x256xf32, #tpu.memory_space<vmem>>, vector<1x4x256xf32>,
    return
  }
}

</mosaic_0001>

<bundles_post_ra>
// kernel: tpu_custom_call.1
= control target key start
LH: loop header
LB: loop body
LE: loop exit
PB: predicated region body
PF: predicated region fallthrough
CT: control target
= control target key end

     0   :  { %13 = vsyncpa [#allocation4], 0  ;;  %s2150_s0 = inlined_call_operand.vmem [shape: f32[2,4,256], index: 0, kind: input, shape index: {}]   ;;  %s2151_s1 = inlined_call_operand.hbm [shape: f32[9,256], index: 1, kind: input, shape index: {}]   ;;  %s2152_s2 = inlined_call_operand.vmem [shape: bf16[4,36], index: 2, kind: input, shape index: {}]   ;;  %s2153_s3 = inlined_call_operand.vmem [shape: f32[4,1], index: 3, kind: input, shape index: {}]   ;;  %s2154_s4 = inlined_call_operand.vmem [shape: f32[4,1], index: 4, kind: input, shape index: {}]   ;;  %s2155_s5 = inlined_call_operand.vmem [shape: bf16[4,36], index: 5, kind: input, shape index: {}]   ;;  %s2156_s6 = inlined_call_operand.vmem [shape: f32[4,1], index: 6, kind: input, shape index: {}]   ;;  %s2157_s7 = inlined_call_operand.vmem [shape: f32[4,1], index: 7, kind: input, shape index: {}]   ;;  %s2158_s8 = inlined_call_operand.hbm [shape: f32[2,4,256], index: 8, kind: output, shape index: {}]  }
   0x1   :  { %14 = vsyncpa [#allocation5], 0  ;;  %s1732_s27 = smov [#allocation3]   ;;  %s1684_s9 = scalar_lea.hbm %s2151_s1, 512 }
   0x2   :  { %s22_s28 = sshll.u32 %s1732_s27, 4  ;;  %p1685_p0 = scmp.ne.s32.totalorder %s2151_s1, %s1684_s9  ;;  %s23_s28 = int_to_ptr.vmem [resolvable:$true] %s22_s28 }
   0x3   :  { %p1688_p1 = scmp.lt.u32.totalorder %s1684_s9, %s2151_s1 }
   0x5   :  { %p1690_p2 = pnand %p1688_p1, %p1685_p0 }
   0x7   :  { %1693 = shalt.err (!%p1690_p2)
}
   0x8   :  { %s1694_s14 = scalar_lea.vmem %s23_s28, 512  ;;  %p1699_p4 = scmp.lt.s32.totalorder %s23_s28, %s23_s28 }
   0x9   :  { %p1695_p3 = scmp.ne.s32.totalorder %s23_s28, %s1694_s14  ;;  %p1700_p5 = scmp.lt.s32.totalorder %s1694_s14, %s1694_s14 }
   0xb   :  { %p1701_p6 = por %p1700_p5, %p1699_p4 }
   0xd   :  { %p1702_p7 = pnand %p1701_p6, %p1695_p3 }
   0xf   :  { %1705 = shalt.err (!%p1702_p7)
}
  0x10   :  { %s1733_s15 = smov 256   ;;  %s1734_s16 = smov 16  }
  0x11   :  { %28 = dma.hbm_to_vmem [thread:$0]  %s2151_s1, 512, %s23_s28, [#allocation4], %s1733_s15, %s1733_s15, %s1734_s16  }
  0x12   :  { %1728 = dma.done.wait [#allocation4], 512  }
  0x13   :  { %1729 = vsyncadd [#allocation4], 4294966784  ;;  %v46_v0 = vld [vmem:[%s2150_s0] sm:$0xff]  ;;  %s1735_s21 = smov 1   ;;  %s1736_s22 = smov 17   ;;  %v1531_v2 = vld [vmem:[%s2150_s0 + $0x8] sm:$0xff]  ;;  %v54_v7 = vlaneseq }
  0x14   :  { %145 = vrot.lane.b32.xlu1 %v46_v0, %s1735_s21  ;;  %82 = vrot.lane.b32.xlu0 %v46_v0, %s1734_s16  ;;  %v48_v1 = vcombine.high %v46_v0, %v46_v0  ;;  %s1737_s24 = smov 15   ;;  %v315_v3 = vcombine.high %v1531_v2, %v1531_v2  ;;  %s1738_s25 = smov 127   ;;  %v1742_v6 = vmov 0   ;;  %v153_v12 = vld [vmem:[#allocation3 + $0x3] ss:$8 sm:$0x3] }
  0x15   :  { %s1739_s26 = smov 112   ;;  %s1740_s27 = smov 113   ;;  %671 = vmatprep.mubr.bf16.mxu0 %v1742_v6  ;;  %712 = vmatprep.mubr.bf16.mxu1 %v1742_v6  ;;  %v62_v8 = vshrl.u32 %v54_v7, 7  ;;  %v1846_v9 = vand.u32 127, %v54_v7  ;;  %vm626_vm8 = vcmask 1041408   ;;  %vm622_vm9 = vcmask 293888  }
  0x16   :  { %v1596_v4 = vpack.c.bf16 %v48_v1, %v46_v0  ;;  %v1605_v5 = vpack.c.bf16 %v315_v3, %v1531_v2  ;;  %s1741_s28 = smov 111   ;;  %1642 = vset.pattern.permute.xlu0 %v1742_v6  ;;  %1643 = vset.pattern.permute.xlu1 %v1742_v6  ;;  %v59_v17 = vld [vmem:[#allocation3] ss:$8 sm:$0x3]  ;;  %vm721_vm10 = vcmask 1043456  }
  0x17   :  { %v1848_v10 = vsub.s32 0, %v62_v8  ;;  %v1850_v11 = vsub.s32 1, %v62_v8  ;;  %vm149_vm0 = vcmp.lt.s32.totalorder %v1846_v9, 1  ;;  %v90_v18 = vld [vmem:[#allocation3 + $0x1] ss:$8 sm:$0x3] }
  0x18   :  { %50 = vrot.lane.b32.xlu0 %v46_v0, %s1736_s22  ;;  %147 = vrot.lane.b32.xlu1 %v48_v1, %s1735_s21  ;;  %185 = vst [vmem:[#allocation2 + $0x20] sm:$0x33] %v1596_v4  ;;  %443 = vst [vmem:[#allocation2 + $0x28] sm:$0x33] %v1605_v5  ;;  %vm56_vm1 = vcmp.lt.s32.totalorder %v1846_v9, 17  ;;  %vm86_vm2 = vcmp.lt.s32.totalorder %v1846_v9, 16 }
  0x19   :  { %v158_v15 = vrot.slane %v153_v12, %v1848_v10  ;;  %v162_v16 = vrot.slane %v153_v12, %v1850_v11  ;;  %v64_v23 = vrot.slane %v59_v17, %v1848_v10  ;;  %v122_v24 = vld [vmem:[#allocation3 + $0x2] ss:$8 sm:$0x3]  ;;  %v68_v27 = vrot.slane %v59_v17, %v1850_v11  ;;  %v352_v44 = vld [vmem:[#allocation3 + $0x1] ss:$8 sm:$0x3] }
  0x1a   :  { %v95_v28 = vrot.slane %v90_v18, %v1848_v10  ;;  %v99_v29 = vrot.slane %v90_v18, %v1850_v11  ;;  %vm118_vm3 = vcmp.lt.s32.totalorder %v1846_v9, 15  ;;  %v127_v33 = vrot.slane %v122_v24, %v1848_v10  ;;  %v411_v56 = vld [vmem:[#allocation3 + $0x3] ss:$8 sm:$0x3] }
  0x1b   :  { %v131_v34 = vrot.slane %v122_v24, %v1850_v11  ;;  %v357_v53 = vrot.slane %v352_v44, %v1848_v10  ;;  %v361_v54 = vrot.slane %v352_v44, %v1850_v11  ;;  %vm190_vm4 = vcmp.lt.s32.totalorder %v1846_v9, 127  ;;  %v257_v17 = vld [vmem:[#allocation3 + $0x7] ss:$8 sm:$0x3] }
  0x1c   :  { %52 = vrot.lane.b32.xlu1 %v48_v1, %s1736_s22  ;;  %84 = vrot.lane.b32.xlu0 %v48_v1, %s1734_s16  ;;  %vm253_vm5 = vcmp.lt.s32.totalorder %v1846_v9, 112  ;;  %v262_v24 = vrot.slane %v257_v17, %v1848_v10  ;;  %vm222_vm6 = vcmp.lt.s32.totalorder %v1846_v9, 113  ;;  %vm285_vm7 = vcmp.lt.s32.totalorder %v1846_v9, 111  ;;  %v778_v9 = vld [vmem:[%s2155_s5] sm:$0x3] }
  0x20   :  { %116 = vrot.lane.b32.xlu1 %v48_v1, %s1737_s24  ;;  %114 = vrot.lane.b32.xlu0 %v46_v0, %s1737_s24 }
  0x24   :  { %348 = vrot.lane.b32.xlu1 %v315_v3, %s1734_s16  ;;  %346 = vrot.lane.b32.xlu0 %v1531_v2, %s1734_s16 }
  0x28   :  { %407 = vrot.lane.b32.xlu1 %v315_v3, %s1735_s21  ;;  %405 = vrot.lane.b32.xlu0 %v1531_v2, %s1735_s21 }
  0x2c   :  { %188 = vrot.lane.b32.xlu1 %v48_v1, %s1738_s25  ;;  %186 = vrot.lane.b32.xlu0 %v46_v0, %s1738_s25 }
  0x30   :  { %251 = vrot.lane.b32.xlu1 %v48_v1, %s1739_s26  ;;  %249 = vrot.lane.b32.xlu0 %v46_v0, %s1739_s26 }
  0x34   :  { %319 = vrot.lane.b32.xlu1 %v315_v3, %s1736_s22  ;;  %317 = vrot.lane.b32.xlu0 %v1531_v2, %s1736_s22 }
  0x38   :  { %378 = vrot.lane.b32.xlu1 %v315_v3, %s1737_s24  ;;  %376 = vrot.lane.b32.xlu0 %v1531_v2, %s1737_s24 }
  0x3c   :  { %220 = vrot.lane.b32.xlu1 %v48_v1, %s1740_s27  ;;  %218 = vrot.lane.b32.xlu0 %v46_v0, %s1740_s27 }
  0x40   :  { %446 = vrot.lane.b32.xlu1 %v315_v3, %s1738_s25  ;;  %444 = vrot.lane.b32.xlu0 %v1531_v2, %s1738_s25 }
  0x44   :  { %505 = vrot.lane.b32.xlu1 %v315_v3, %s1739_s26  ;;  %503 = vrot.lane.b32.xlu0 %v1531_v2, %s1739_s26 }
  0x48   :  { %476 = vrot.lane.b32.xlu1 %v315_v3, %s1740_s27  ;;  %474 = vrot.lane.b32.xlu0 %v1531_v2, %s1740_s27 }
  0x4c   :  { %283 = vrot.lane.b32.xlu1 %v48_v1, %s1741_s28  ;;  %281 = vrot.lane.b32.xlu0 %v46_v0, %s1741_s28  ;;  %v416_v0 = vrot.slane %v411_v56, %v1848_v10  ;;  %v420_v1 = vrot.slane %v411_v56, %v1850_v11 }
  0x50   :  { %535 = vrot.lane.b32.xlu1 %v315_v3, %s1741_s28  ;;  %533 = vrot.lane.b32.xlu0 %v1531_v2, %s1741_s28  ;;  %v194_v2 = vld [vmem:[#allocation3 + $0x5] ss:$8 sm:$0x3] }
  0x51   :  { %v199_v12 = vrot.slane %v194_v2, %v1848_v10 }
  0x86   :  { %v146_v13 = vpop.permute.xlu1 %145  ;;  %v83_v14 = vpop.permute.xlu0 %82 }
  0x8a   :  { %v51_v19 = vpop.permute.xlu0 %50  ;;  %v148_v20 = vpop.permute.xlu1 %147 }
  0x8b   :  { %v150_v21 = vsel %vm149_vm0, %v146_v13, %v148_v20  ;;  %v151_v22 = vsel %vm149_vm0, %v148_v20, %v146_v13 }
  0x8c   :  { %v165_v25 = vmul.f32 %v158_v15, %v151_v22  ;;  %v166_v26 = vmul.f32 %v162_v16, %v150_v21  ;;  %v203_v16 = vrot.slane %v194_v2, %v1850_v11 }
  0x8e   :  { %v1595_v30 = vpack.c.bf16 %v166_v26, %v165_v25  ;;  %v53_v31 = vpop.permute.xlu1 %52  ;;  %v85_v32 = vpop.permute.xlu0 %84 }
  0x8f   :  { %v57_v35 = vsel %vm56_vm1, %v51_v19, %v53_v31  ;;  %v58_v36 = vsel %vm56_vm1, %v53_v31, %v51_v19  ;;  %v87_v37 = vsel %vm86_vm2, %v83_v14, %v85_v32  ;;  %v88_v38 = vsel %vm86_vm2, %v85_v32, %v83_v14 }
  0x90   :  { %v174_v39 = vrot.slane %v1595_v30, 6  ;;  %v71_v40 = vmul.f32 %v64_v23, %v58_v36  ;;  %v72_v41 = vmul.f32 %v68_v27, %v57_v35  ;;  %v102_v42 = vmul.f32 %v95_v28, %v88_v38  ;;  %v323_v30 = vld [vmem:[#allocation3] ss:$8 sm:$0x3] }
  0x91   :  { %v103_v43 = vmul.f32 %v99_v29, %v87_v37  ;;  %v266_v29 = vrot.slane %v257_v17, %v1850_v11  ;;  %v328_v36 = vrot.slane %v323_v30, %v1848_v10 }
  0x92   :  { %176 = vst [vmem:[#allocation2 + $0x10] sm:$0xcc] %v174_v39  ;;  %v1592_v45 = vpack.c.bf16 %v72_v41, %v71_v40  ;;  %v117_v46 = vpop.permute.xlu1 %116  ;;  %v115_v47 = vpop.permute.xlu0 %114  ;;  %v332_v40 = vrot.slane %v323_v30, %v1850_v11  ;;  %v382_v41 = vld [vmem:[#allocation3 + $0x2] ss:$8 sm:$0x3] }
  0x93   :  { %v1593_v48 = vpack.c.bf16 %v103_v43, %v102_v42  ;;  %v119_v49 = vsel %vm118_vm3, %v115_v47, %v117_v46  ;;  %v120_v50 = vsel %vm118_vm3, %v117_v46, %v115_v47  ;;  %v387_v47 = vrot.slane %v382_v41, %v1848_v10 }
  0x94   :  { %81 = vst [vmem:[#allocation2] sm:$0x33] %v1592_v45  ;;  %v134_v51 = vmul.f32 %v127_v33, %v120_v50  ;;  %v135_v52 = vmul.f32 %v131_v34, %v119_v49 }
  0x95   :  { %v111_v55 = vrot.slane %v1593_v48, 6 }
  0x96   :  { %v1594_v57 = vpack.c.bf16 %v135_v52, %v134_v51  ;;  %v349_v58 = vpop.permute.xlu1 %348  ;;  %v347_v59 = vpop.permute.xlu0 %346  ;;  %v391_v51 = vrot.slane %v382_v41, %v1850_v11  ;;  %v226_v52 = vld [vmem:[#allocation3 + $0x6] ss:$8 sm:$0x3] }
  0x97   :  { %113 = vst [vmem:[#allocation2] sm:$0xcc] %v111_v55  ;;  %v350_v60 = vsel %vm86_vm2, %v347_v59, %v349_v58  ;;  %v351_v61 = vsel %vm86_vm2, %v349_v58, %v347_v59 }
  0x98   :  { %144 = vst [vmem:[#allocation2 + $0x10] sm:$0x33] %v1594_v57  ;;  %v364_v62 = vmul.f32 %v357_v53, %v351_v61  ;;  %v365_v63 = vmul.f32 %v361_v54, %v350_v60  ;;  %v231_v60 = vrot.slane %v226_v52, %v1848_v10  ;;  %v235_v61 = vrot.slane %v226_v52, %v1850_v11 }
  0x9a   :  { %v1602_v3 = vpack.c.bf16 %v365_v63, %v364_v62  ;;  %v408_v4 = vpop.permute.xlu1 %407  ;;  %v406_v5 = vpop.permute.xlu0 %405  ;;  %v450_v62 = vld [vmem:[#allocation3 + $0x5] ss:$8 sm:$0x3] }
  0x9b   :  { %v409_v7 = vsel %vm149_vm0, %v406_v5, %v408_v4  ;;  %v410_v8 = vsel %vm149_vm0, %v408_v4, %v406_v5 }
  0x9c   :  { %v373_v13 = vrot.slane %v1602_v3, 6  ;;  %v423_v14 = vmul.f32 %v416_v0, %v410_v8  ;;  %v424_v15 = vmul.f32 %v420_v1, %v409_v7  ;;  %v455_v7 = vrot.slane %v450_v62, %v1848_v10 }
  0x9d   :  { %v459_v8 = vrot.slane %v450_v62, %v1850_v11 }
  0x9e   :  { %375 = vst [vmem:[#allocation2 + $0x8] sm:$0xcc] %v373_v13  ;;  %v1604_v18 = vpack.c.bf16 %v424_v15, %v423_v14  ;;  %v189_v19 = vpop.permute.xlu1 %188  ;;  %v187_v20 = vpop.permute.xlu0 %186 }
  0x9f   :  { %v191_v21 = vsel %vm190_vm4, %v187_v20, %v189_v19  ;;  %v192_v22 = vsel %vm190_vm4, %v189_v19, %v187_v20  ;;  %v1646_v23 = vld [vmem:[#allocation2 + $0x4] ss:$16 sps:$4 sm:$0xff]   ;;  %v1648_v25 = vld [vmem:[#allocation2] ss:$16 sps:$4 sm:$0xff]  }
  0xa0   :  { %v432_v26 = vrot.slane %v1604_v18, 6  ;;  %v206_v27 = vmul.f32 %v199_v12, %v191_v21  ;;  %v207_v28 = vmul.f32 %v203_v16, %v192_v22  ;;  %639 = vmatprep.subr.bf16.mxu0 %v1646_v23  ;;  %v509_v12 = vld [vmem:[#allocation3 + $0x7] ss:$8 sm:$0x3] }
  0xa1   :  { %640 = vmatpush1.bf16.msra.mxu0 %v1648_v25  ;;  %v514_v20 = vrot.slane %v509_v12, %v1848_v10  ;;  %v518_v21 = vrot.slane %v509_v12, %v1850_v11  ;;  %v480_v22 = vld [vmem:[#allocation3 + $0x6] ss:$8 sm:$0x3]  ;;  %v45_v12 = vld [vmem:[%s2152_s2] sm:$0x3] }
  0xa2   :  { %434 = vst [vmem:[#allocation2 + $0x18] sm:$0xcc] %v432_v26  ;;  %v1597_v31 = vpack.c.bf16 %v207_v28, %v206_v27  ;;  %v252_v32 = vpop.permute.xlu1 %251  ;;  %v250_v33 = vpop.permute.xlu0 %249 }
  0xa3   :  { %v254_v34 = vsel %vm253_vm5, %v250_v33, %v252_v32  ;;  %v255_v35 = vsel %vm253_vm5, %v252_v32, %v250_v33 }
  0xa4   :  { %v215_v37 = vrot.slane %v1597_v31, 6  ;;  %v269_v38 = vmul.f32 %v262_v24, %v254_v34  ;;  %v270_v39 = vmul.f32 %v266_v29, %v255_v35  ;;  %v485_v29 = vrot.slane %v480_v22, %v1848_v10  ;;  %v289_v35 = vld [vmem:[#allocation3 + $0x10] ss:$8 sm:$0x3] }
  0xa5   :  { %v489_v34 = vrot.slane %v480_v22, %v1850_v11  ;;  %v294_v41 = vrot.slane %v289_v35, %v1848_v10 }
  0xa6   :  { %217 = vst [vmem:[#allocation2 + $0x20] sm:$0xcc] %v215_v37  ;;  %v1599_v42 = vpack.c.bf16 %v270_v39, %v269_v38  ;;  %v320_v43 = vpop.permute.xlu1 %319  ;;  %v318_v44 = vpop.permute.xlu0 %317 }
  0xa7   :  { %v321_v45 = vsel %vm56_vm1, %v318_v44, %v320_v43  ;;  %v322_v46 = vsel %vm56_vm1, %v320_v43, %v318_v44 }
  0xa8   :  { %v278_v48 = vrot.slane %v1599_v42, 6  ;;  %v335_v49 = vmul.f32 %v328_v36, %v322_v46  ;;  %v336_v50 = vmul.f32 %v332_v40, %v321_v45 }
  0xaa   :  { %280 = vst [vmem:[#allocation2 + $0x30] sm:$0xcc] %v278_v48  ;;  %v1601_v53 = vpack.c.bf16 %v336_v50, %v335_v49  ;;  %v379_v54 = vpop.permute.xlu1 %378  ;;  %v377_v55 = vpop.permute.xlu0 %376  ;;  %v539_v48 = vld [vmem:[#allocation3 + $0x10] ss:$8 sm:$0x3] }
  0xab   :  { %v380_v56 = vsel %vm118_vm3, %v377_v55, %v379_v54  ;;  %v381_v57 = vsel %vm118_vm3, %v379_v54, %v377_v55 }
  0xac   :  { %345 = vst [vmem:[#allocation2 + $0x8] sm:$0x33] %v1601_v53  ;;  %v394_v58 = vmul.f32 %v387_v47, %v381_v57  ;;  %v395_v59 = vmul.f32 %v391_v51, %v380_v56  ;;  %v298_v47 = vrot.slane %v289_v35, %v1850_v11  ;;  %v544_v56 = vrot.slane %v539_v48, %v1848_v10 }
  0xad   :  { %v548_v57 = vrot.slane %v539_v48, %v1850_v11 }
  0xae   :  { %v1603_v63 = vpack.c.bf16 %v395_v59, %v394_v58  ;;  %v221_v0 = vpop.permute.xlu1 %220  ;;  %v219_v1 = vpop.permute.xlu0 %218 }
  0xaf   :  { %v223_v2 = vsel %vm222_vm6, %v219_v1, %v221_v0  ;;  %v224_v3 = vsel %vm222_vm6, %v221_v0, %v219_v1 }
  0xb0   :  { %404 = vst [vmem:[#allocation2 + $0x18] sm:$0x33] %v1603_v63  ;;  %v238_v4 = vmul.f32 %v231_v60, %v223_v2  ;;  %v239_v5 = vmul.f32 %v235_v61, %v224_v3 }
  0xb2   :  { %v1598_v13 = vpack.c.bf16 %v239_v5, %v238_v4  ;;  %v447_v14 = vpop.permute.xlu1 %446  ;;  %v445_v15 = vpop.permute.xlu0 %444 }
  0xb3   :  { %v448_v16 = vsel %vm190_vm4, %v445_v15, %v447_v14  ;;  %v449_v17 = vsel %vm190_vm4, %v447_v14, %v445_v15 }
  0xb4   :  { %248 = vst [vmem:[#allocation2 + $0x30] sm:$0x33] %v1598_v13  ;;  %v462_v18 = vmul.f32 %v455_v7, %v448_v16  ;;  %v463_v19 = vmul.f32 %v459_v8, %v449_v17 }
  0xb6   :  { %v1606_v23 = vpack.c.bf16 %v463_v19, %v462_v18  ;;  %v506_v24 = vpop.permute.xlu1 %505  ;;  %v504_v25 = vpop.permute.xlu0 %503 }
  0xb7   :  { %v507_v26 = vsel %vm253_vm5, %v504_v25, %v506_v24  ;;  %v508_v27 = vsel %vm253_vm5, %v506_v24, %v504_v25  ;;  %v1649_v28 = vld [vmem:[#allocation2 + $0xc] ss:$16 sps:$4 sm:$0xff]   ;;  %v1651_v30 = vld [vmem:[#allocation2 + $0x8] ss:$16 sps:$4 sm:$0xff]  }
  0xb8   :  { %v471_v31 = vrot.slane %v1606_v23, 6  ;;  %v521_v32 = vmul.f32 %v514_v20, %v507_v26  ;;  %v522_v33 = vmul.f32 %v518_v21, %v508_v27  ;;  %680 = vmatprep.subr.bf16.mxu1 %v1649_v28 }
  0xb9   :  { %681 = vmatpush1.bf16.msra.mxu1 %v1651_v30 }
  0xba   :  { %473 = vst [vmem:[#allocation2 + $0x28] sm:$0xcc] %v471_v31  ;;  %v1608_v36 = vpack.c.bf16 %v522_v33, %v521_v32  ;;  %v477_v37 = vpop.permute.xlu1 %476  ;;  %v475_v38 = vpop.permute.xlu0 %474 }
  0xbb   :  { %v478_v39 = vsel %vm222_vm6, %v475_v38, %v477_v37  ;;  %v479_v40 = vsel %vm222_vm6, %v477_v37, %v475_v38  ;;  %v1652_v42 = vld [vmem:[#allocation2 + $0x24] ss:$16 sps:$4 sm:$0xff]   ;;  %v1654_v43 = vld [vmem:[#allocation2 + $0x20] ss:$16 sps:$4 sm:$0xff]  }
  0xbc   :  { %v530_v44 = vrot.slane %v1608_v36, 6  ;;  %v492_v45 = vmul.f32 %v485_v29, %v478_v39  ;;  %v493_v46 = vmul.f32 %v489_v34, %v479_v40  ;;  %641 = vmatprep.subr.bf16.mxu0 %v1652_v42 }
  0xbd   :  { %642 = vmatpush1.bf16.msra.mxu0 %v1654_v43 }
  0xbe   :  { %532 = vst [vmem:[#allocation2 + $0x38] sm:$0xcc] %v530_v44  ;;  %v1607_v49 = vpack.c.bf16 %v493_v46, %v492_v45  ;;  %v284_v50 = vpop.permute.xlu1 %283  ;;  %v282_v51 = vpop.permute.xlu0 %281 }
  0xbf   :  { %v286_v52 = vsel %vm285_vm7, %v282_v51, %v284_v50  ;;  %v287_v53 = vsel %vm285_vm7, %v284_v50, %v282_v51  ;;  %v749_v50 = vld [vmem:[%s2153_s3] sm:$0xf] }
  0xc0   :  { %502 = vst [vmem:[#allocation2 + $0x38] sm:$0x33] %v1607_v49  ;;  %v301_v54 = vmul.f32 %v294_v41, %v286_v52  ;;  %v302_v55 = vmul.f32 %v298_v47, %v287_v53  ;;  %v762_v53 = vld [vmem:[%s2154_s4] sm:$0xf] }
  0xc2   :  { %v1600_v58 = vpack.c.bf16 %v302_v55, %v301_v54  ;;  %v536_v59 = vpop.permute.xlu1 %535  ;;  %v534_v60 = vpop.permute.xlu0 %533 }
  0xc3   :  { %v537_v61 = vsel %vm285_vm7, %v534_v60, %v536_v59  ;;  %v538_v62 = vsel %vm285_vm7, %v536_v59, %v534_v60 }
  0xc4   :  { %311 = vst [vmem:[#allocation2 + $0x40] sm:$0x33] %v1600_v58  ;;  %v551_v63 = vmul.f32 %v544_v56, %v537_v61  ;;  %v552_v0 = vmul.f32 %v548_v57, %v538_v62 }
  0xc6   :  { %v1609_v1 = vpack.c.bf16 %v552_v0, %v551_v63 }
  0xc7   :  { %v1655_v2 = vld [vmem:[#allocation2 + $0x2c] ss:$16 sps:$4 sm:$0xff]   ;;  %v1657_v3 = vld [vmem:[#allocation2 + $0x28] ss:$16 sps:$4 sm:$0xff]  }
  0xc8   :  { %561 = vst [vmem:[#allocation2 + $0x48] sm:$0x33] %v1609_v1  ;;  %682 = vmatprep.subr.bf16.mxu1 %v1655_v2 }
  0xc9   :  { %683 = vmatpush1.bf16.msra.mxu1 %v1657_v3 }
  0xcb   :  { %v570_v4 = vld [vmem:[#allocation2 + $0x40] sm:$0x33] }
  0xcc   :  { %v1550_v5 = vcombine.high %v570_v4, %v570_v4  ;;  %v1549_v7 = vcombine.low %v570_v4, %v570_v4 }
  0xce   :  { %1553 = vmatprep.subr.msk.bf16.mxu0 %vm626_vm8, %v1550_v5  ;;  %v628_v8 = vsel %vm626_vm8, %v1549_v7, 0 }
  0xcf   :  { %644 = vmatpush1.bf16.msra.mxu0 %v628_v8  ;;  %v571_v13 = vld [vmem:[#allocation2 + $0x48] sm:$0x33] }
  0xd0   :  { %v1552_v14 = vcombine.high %v571_v13, %v571_v13  ;;  %v1551_v15 = vcombine.low %v571_v13, %v571_v13 }
  0xd2   :  { %1554 = vmatmul.mubr.msk.bf16.vlgmr.msra.gmra.mrb[0].mxu0 %vm622_vm9, %v45_v12  ;;  %1555 = vmatprep.subr.msk.bf16.mxu1 %vm626_vm8, %v1552_v14  ;;  %v634_v16 = vsel %vm626_vm8, %v1551_v15, 0 }
  0xd3   :  { %685 = vmatpush1.bf16.msra.mxu1 %v634_v16  ;;  %1376 = vmatprep.mubr.bf16.mxu0 %v1742_v6 }
  0xd6   :  { %1556 = vmatmul.mubr.msk.bf16.vlgmr.msra.gmra.mrb[0].mxu1 %vm622_vm9, %v45_v12  ;;  %v814_v12 = vld [vmem:[#allocation3 + $0x1] ss:$8 sm:$0x3] }
  0xd7   :  { %1417 = vmatprep.mubr.bf16.mxu1 %v1742_v6  ;;  %v819_v15 = vrot.slane %v814_v12, %v1848_v10  ;;  %v823_v16 = vrot.slane %v814_v12, %v1850_v11 }
 0x1a5   :  { %v673_v17 = vpop.f32.mrb[0].mxu0 }
 0x1a6   :  { %v722_v18 = vsel %vm721_vm10, %v673_v17, 0.0  ;;  %v731_v19 = vmul.f32 %v673_v17, %v673_v17  ;;  %v675_v20 = vpop.f32.mrb[1].mxu0 }
 0x1a7   :  { %v723_v21 = vsel %vm721_vm10, %v675_v20, 0.0  ;;  %v732_v22 = vmul.f32 %v675_v20, %v675_v20  ;;  %v677_v23 = vpop.f32.mrb[2].mxu0 }
 0x1a8   :  { %v735_v24 = vsel %vm721_vm10, %v731_v19, 0.0  ;;  %v724_v25 = vadd.f32 %v723_v21, %v722_v18  ;;  %v678_v26 = vpop.f32.mrb[3].mxu0  ;;  %v873_v23 = vld [vmem:[#allocation3 + $0x3] ss:$8 sm:$0x3] }
 0x1a9   :  { %v736_v27 = vsel %vm721_vm10, %v732_v22, 0.0  ;;  %v714_v28 = vpop.f32.mrb[0].mxu1 }
 0x1aa   :  { %v725_v29 = vsel %vm721_vm10, %v714_v28, 0.0  ;;  %v733_v6 = vmul.f32 %v714_v28, %v714_v28  ;;  %v716_v30 = vpop.f32.mrb[1].mxu1  ;;  %v737_v31 = vadd.f32 %v736_v27, %v735_v24  ;;  %v878_v27 = vrot.slane %v873_v23, %v1848_v10 }
 0x1ab   :  { %v734_v32 = vmul.f32 %v716_v30, %v716_v30  ;;  %v718_v33 = vpop.f32.mrb[2].mxu1  ;;  %v726_v34 = vadd.f32 %v725_v29, %v724_v25  ;;  %v727_v35 = vsel %vm721_vm10, %v716_v30, 0.0 }
 0x1ac   :  { %v719_v36 = vpop.f32.mrb[3].mxu1  ;;  %v738_v37 = vsel %vm721_vm10, %v733_v6, 0.0 }
 0x1ad   :  { %v728_v38 = vadd.f32 %v727_v35, %v726_v34  ;;  %v739_v39 = vadd.f32 %v738_v37, %v737_v31  ;;  %v740_v40 = vsel %vm721_vm10, %v734_v32, 0.0  ;;  %v785_v34 = vld [vmem:[#allocation3] ss:$8 sm:$0x3] }
 0x1af   :  { %729 = vadd.xlane.f32.xlu0 %v728_v38  ;;  %v741_v41 = vadd.f32 %v740_v40, %v739_v39  ;;  %v790_v39 = vrot.slane %v785_v34, %v1848_v10  ;;  %v794_v40 = vrot.slane %v785_v34, %v1850_v11 }
 0x1b1   :  { %742 = vadd.xlane.f32.xlu1 %v741_v41  ;;  %v844_v41 = vld [vmem:[#allocation3 + $0x2] ss:$8 sm:$0x3] }
 0x23c   :  { %v730_v42 = vpop.xlane.xlu0 %729 }
 0x23d   :  { %v744_v43 = vmul.f32 0.001953125, %v730_v42 }
 0x23e   :  { %v743_v44 = vpop.xlane.xlu1 %742 }
 0x23f   :  { %v746_v45 = vmul.f32 %v744_v43, %v744_v43  ;;  %v745_v46 = vmul.f32 0.001953125, %v743_v44 }
 0x241   :  { %v747_v47 = vsub.f32 %v745_v46, %v746_v45 }
 0x243   :  { %v748_v48 = vmax.f32 %v747_v47, 0.0  ;;  %v849_v47 = vrot.slane %v844_v41, %v1848_v10 }
 0x245   :  { %v750_v49 = vadd.f32 1e-05, %v748_v48  ;;  %v853_v48 = vrot.slane %v844_v41, %v1850_v11 }
 0x247   :  { %1680 = vrsqrt.f32 %v750_v49  ;;  %v1059_v49 = vld [vmem:[#allocation3 + $0x1] ss:$8 sm:$0x3] }
 0x251   :  { %v1681_v51 = vpop.eup %1680 }
 0x252   :  { %v752_v52 = vmul.f32 %v1681_v51, %v749_v50 }
 0x254   :  { %755 = vperm.xlu0 %1642, %v752_v52   ;;  %v763_v54 = vmul.f32 %v752_v52, %v744_v43 }
 0x256   :  { %v764_v55 = vsub.f32 %v762_v53, %v763_v54 }
 0x258   :  { %767 = vperm.xlu1 %1643, %v764_v55  }
 0x2d3   :  { %v756_v56 = vpop.permute.xlu0 %755 }
 0x2d4   :  { %v758_v57 = vmul.f32 %v756_v56, %v673_v17  ;;  %v759_v58 = vmul.f32 %v756_v56, %v675_v20  ;;  %v760_v59 = vmul.f32 %v756_v56, %v714_v28  ;;  %v761_v60 = vmul.f32 %v756_v56, %v716_v30 }
 0x2d5   :  { %v882_v28 = vrot.slane %v873_v23, %v1850_v11 }
 0x2d7   :  { %v768_v61 = vpop.permute.xlu1 %767 }
 0x2d8   :  { %v770_v62 = vadd.f32 %v768_v61, %v758_v57  ;;  %v771_v63 = vadd.f32 %v768_v61, %v759_v58  ;;  %v772_v0 = vadd.f32 %v768_v61, %v760_v59  ;;  %v773_v1 = vadd.f32 %v768_v61, %v761_v60  ;;  %v1118_v59 = vld [vmem:[#allocation3 + $0x3] ss:$8 sm:$0x3] }
 0x2d9   :  { %v1064_v57 = vrot.slane %v1059_v49, %v1848_v10  ;;  %v1068_v58 = vrot.slane %v1059_v49, %v1850_v11 }
 0x2da   :  { %v774_v2 = vmax.f32 %v770_v62, 0.0  ;;  %v775_v3 = vmax.f32 %v771_v63, 0.0  ;;  %v776_v4 = vmax.f32 %v772_v0, 0.0  ;;  %v777_v5 = vmax.f32 %v773_v1, 0.0 }
 0x2dc   :  { %838 = vrot.lane.b32.xlu0 %v774_v2, %s1737_s24  ;;  %808 = vrot.lane.b32.xlu1 %v774_v2, %s1734_s16  ;;  %v1614_v7 = vpack.c.bf16 %v775_v3, %v774_v2  ;;  %v1623_v8 = vpack.c.bf16 %v777_v5, %v776_v4 }
 0x2de   :  { %905 = vst [vmem:[#allocation2 + $0x20] sm:$0x33] %v1614_v7  ;;  %1150 = vst [vmem:[#allocation2 + $0x28] sm:$0x33] %v1623_v8 }
 0x2e0   :  { %1053 = vrot.lane.b32.xlu0 %v776_v4, %s1734_s16  ;;  %810 = vrot.lane.b32.xlu1 %v775_v3, %s1734_s16 }
 0x2e4   :  { %1112 = vrot.lane.b32.xlu0 %v776_v4, %s1735_s21  ;;  %867 = vrot.lane.b32.xlu1 %v774_v2, %s1735_s21 }
 0x2e8   :  { %906 = vrot.lane.b32.xlu0 %v774_v2, %s1738_s25  ;;  %869 = vrot.lane.b32.xlu1 %v775_v3, %s1735_s21 }
 0x2ec   :  { %965 = vrot.lane.b32.xlu0 %v774_v2, %s1739_s26  ;;  %779 = vrot.lane.b32.xlu1 %v774_v2, %s1736_s22 }
 0x2f0   :  { %1024 = vrot.lane.b32.xlu0 %v776_v4, %s1736_s22  ;;  %781 = vrot.lane.b32.xlu1 %v775_v3, %s1736_s22 }
 0x2f4   :  { %1083 = vrot.lane.b32.xlu0 %v776_v4, %s1737_s24  ;;  %840 = vrot.lane.b32.xlu1 %v775_v3, %s1737_s24 }
 0x2f8   :  { %936 = vrot.lane.b32.xlu0 %v774_v2, %s1740_s27  ;;  %1055 = vrot.lane.b32.xlu1 %v777_v5, %s1734_s16 }
 0x2fc   :  { %1151 = vrot.lane.b32.xlu0 %v776_v4, %s1738_s25  ;;  %1114 = vrot.lane.b32.xlu1 %v777_v5, %s1735_s21 }
 0x300   :  { %1210 = vrot.lane.b32.xlu0 %v776_v4, %s1739_s26  ;;  %908 = vrot.lane.b32.xlu1 %v775_v3, %s1738_s25 }
 0x304   :  { %1181 = vrot.lane.b32.xlu0 %v776_v4, %s1740_s27  ;;  %967 = vrot.lane.b32.xlu1 %v775_v3, %s1739_s26 }
 0x308   :  { %995 = vrot.lane.b32.xlu0 %v774_v2, %s1741_s28  ;;  %1026 = vrot.lane.b32.xlu1 %v777_v5, %s1736_s22 }
 0x30c   :  { %1240 = vrot.lane.b32.xlu0 %v776_v4, %s1741_s28  ;;  %1085 = vrot.lane.b32.xlu1 %v777_v5, %s1737_s24  ;;  %v1127_v4 = vrot.slane %v1118_v59, %v1850_v11 }
 0x310   :  { %938 = vrot.lane.b32.xlu1 %v775_v3, %s1740_s27 }
 0x314   :  { %1153 = vrot.lane.b32.xlu1 %v777_v5, %s1738_s25 }
 0x318   :  { %1212 = vrot.lane.b32.xlu1 %v777_v5, %s1739_s26 }
 0x31c   :  { %1183 = vrot.lane.b32.xlu1 %v777_v5, %s1740_s27 }
 0x320   :  { %997 = vrot.lane.b32.xlu1 %v775_v3, %s1741_s28  ;;  %v1123_v3 = vrot.slane %v1118_v59, %v1848_v10 }
 0x324   :  { %1242 = vrot.lane.b32.xlu1 %v777_v5, %s1741_s28  ;;  %v912_v5 = vld [vmem:[#allocation3 + $0x5] ss:$8 sm:$0x3] }
 0x34e   :  { %v839_v13 = vpop.permute.xlu0 %838  ;;  %v809_v14 = vpop.permute.xlu1 %808 }
 0x352   :  { %v811_v17 = vpop.permute.xlu1 %810  ;;  %v1054_v20 = vpop.permute.xlu0 %1053 }
 0x353   :  { %v812_v18 = vsel %vm86_vm2, %v809_v14, %v811_v17  ;;  %v813_v19 = vsel %vm86_vm2, %v811_v17, %v809_v14  ;;  %v917_v14 = vrot.slane %v912_v5, %v1848_v10 }
 0x354   :  { %v826_v21 = vmul.f32 %v819_v15, %v813_v19  ;;  %v827_v22 = vmul.f32 %v823_v16, %v812_v18  ;;  %v921_v18 = vrot.slane %v912_v5, %v1850_v11  ;;  %v971_v19 = vld [vmem:[#allocation3 + $0x7] ss:$8 sm:$0x3] }
 0x356   :  { %v1611_v24 = vpack.c.bf16 %v827_v22, %v826_v21  ;;  %v868_v25 = vpop.permute.xlu1 %867  ;;  %v1113_v29 = vpop.permute.xlu0 %1112 }
 0x358   :  { %v835_v26 = vrot.slane %v1611_v24, 6 }
 0x35a   :  { %837 = vst [vmem:[#allocation2] sm:$0xcc] %v835_v26  ;;  %v870_v6 = vpop.permute.xlu1 %869  ;;  %v907_v37 = vpop.permute.xlu0 %906 }
 0x35b   :  { %v871_v30 = vsel %vm149_vm0, %v868_v25, %v870_v6  ;;  %v872_v31 = vsel %vm149_vm0, %v870_v6, %v868_v25 }
 0x35c   :  { %v885_v32 = vmul.f32 %v878_v27, %v872_v31  ;;  %v886_v33 = vmul.f32 %v882_v28, %v871_v30  ;;  %v976_v27 = vrot.slane %v971_v19, %v1848_v10  ;;  %v980_v30 = vrot.slane %v971_v19, %v1850_v11  ;;  %v1030_v31 = vld [vmem:[#allocation3] ss:$8 sm:$0x3] }
 0x35d   :  { %v1039_v41 = vrot.slane %v1030_v31, %v1850_v11 }
 0x35e   :  { %v1613_v35 = vpack.c.bf16 %v886_v33, %v885_v32  ;;  %v780_v36 = vpop.permute.xlu1 %779  ;;  %v966_v50 = vpop.permute.xlu0 %965 }
 0x360   :  { %v894_v38 = vrot.slane %v1613_v35, 6 }
 0x362   :  { %896 = vst [vmem:[#allocation2 + $0x10] sm:$0xcc] %v894_v38  ;;  %v782_v42 = vpop.permute.xlu1 %781  ;;  %v1025_v0 = vpop.permute.xlu0 %1024 }
 0x363   :  { %v783_v43 = vsel %vm56_vm1, %v780_v36, %v782_v42  ;;  %v784_v44 = vsel %vm56_vm1, %v782_v42, %v780_v36  ;;  %v1035_v36 = vrot.slane %v1030_v31, %v1848_v10  ;;  %v1089_v42 = vld [vmem:[#allocation3 + $0x2] ss:$8 sm:$0x3] }
 0x364   :  { %v797_v45 = vmul.f32 %v790_v39, %v784_v44  ;;  %v798_v46 = vmul.f32 %v794_v40, %v783_v43 }
 0x366   :  { %v1610_v51 = vpack.c.bf16 %v798_v46, %v797_v45  ;;  %v841_v52 = vpop.permute.xlu1 %840 }
 0x367   :  { %v842_v53 = vsel %vm118_vm3, %v839_v13, %v841_v52  ;;  %v843_v54 = vsel %vm118_vm3, %v841_v52, %v839_v13  ;;  %v942_v52 = vld [vmem:[#allocation3 + $0x6] ss:$8 sm:$0x3] }
 0x368   :  { %807 = vst [vmem:[#allocation2] sm:$0x33] %v1610_v51  ;;  %v856_v55 = vmul.f32 %v849_v47, %v843_v54  ;;  %v857_v56 = vmul.f32 %v853_v48, %v842_v53  ;;  %v1094_v47 = vrot.slane %v1089_v42, %v1848_v10  ;;  %v1098_v51 = vrot.slane %v1089_v42, %v1850_v11 }
 0x36a   :  { %v1612_v60 = vpack.c.bf16 %v857_v56, %v856_v55  ;;  %v1056_v61 = vpop.permute.xlu1 %1055 }
 0x36b   :  { %v1057_v62 = vsel %vm86_vm2, %v1054_v20, %v1056_v61  ;;  %v1058_v63 = vsel %vm86_vm2, %v1056_v61, %v1054_v20  ;;  %v1084_v20 = vpop.permute.xlu0 %1083  ;;  %v951_v61 = vrot.slane %v942_v52, %v1850_v11 }
 0x36c   :  { %866 = vst [vmem:[#allocation2 + $0x10] sm:$0x33] %v1612_v60  ;;  %v1071_v1 = vmul.f32 %v1064_v57, %v1058_v63  ;;  %v1072_v2 = vmul.f32 %v1068_v58, %v1057_v62  ;;  %v947_v60 = vrot.slane %v942_v52, %v1848_v10  ;;  %v1157_v62 = vld [vmem:[#allocation3 + $0x5] ss:$8 sm:$0x3] }
 0x36e   :  { %v1620_v7 = vpack.c.bf16 %v1072_v2, %v1071_v1  ;;  %v1115_v8 = vpop.permute.xlu1 %1114 }
 0x36f   :  { %v1116_v12 = vsel %vm149_vm0, %v1113_v29, %v1115_v8  ;;  %v1117_v13 = vsel %vm149_vm0, %v1115_v8, %v1113_v29  ;;  %v1166_v8 = vrot.slane %v1157_v62, %v1850_v11 }
 0x370   :  { %v1080_v15 = vrot.slane %v1620_v7, 6  ;;  %v1130_v16 = vmul.f32 %v1123_v3, %v1117_v13  ;;  %v1131_v17 = vmul.f32 %v1127_v4, %v1116_v12  ;;  %v1162_v7 = vrot.slane %v1157_v62, %v1848_v10  ;;  %v1216_v12 = vld [vmem:[#allocation3 + $0x7] ss:$8 sm:$0x3] }
 0x371   :  { %v1221_v19 = vrot.slane %v1216_v12, %v1848_v10 }
 0x372   :  { %1082 = vst [vmem:[#allocation2 + $0x8] sm:$0xcc] %v1080_v15  ;;  %v1622_v21 = vpack.c.bf16 %v1131_v17, %v1130_v16  ;;  %v909_v22 = vpop.permute.xlu1 %908 }
 0x373   :  { %v910_v23 = vsel %vm190_vm4, %v907_v37, %v909_v22  ;;  %v911_v24 = vsel %vm190_vm4, %v909_v22, %v907_v37  ;;  %v1662_v25 = vld [vmem:[#allocation2] ss:$16 sps:$4 sm:$0xff]   ;;  %v1664_v26 = vld [vmem:[#allocation2 + $0x4] ss:$16 sps:$4 sm:$0xff]   ;;  %v937_v37 = vpop.permute.xlu0 %936 }
 0x374   :  { %v1139_v28 = vrot.slane %v1622_v21, 6  ;;  %v924_v29 = vmul.f32 %v917_v14, %v910_v23  ;;  %v925_v6 = vmul.f32 %v921_v18, %v911_v24  ;;  %1344 = vmatprep.subr.bf16.mxu0 %v1664_v26  ;;  %v1187_v21 = vld [vmem:[#allocation3 + $0x6] ss:$8 sm:$0x3] }
 0x375   :  { %1345 = vmatpush1.bf16.msra.mxu0 %v1662_v25 }
 0x376   :  { %1141 = vst [vmem:[#allocation2 + $0x18] sm:$0xcc] %v1139_v28  ;;  %v1615_v32 = vpack.c.bf16 %v925_v6, %v924_v29  ;;  %v968_v33 = vpop.permute.xlu1 %967  ;;  %v1192_v29 = vrot.slane %v1187_v21, %v1848_v10 }
 0x377   :  { %v969_v34 = vsel %vm253_vm5, %v966_v50, %v968_v33  ;;  %v970_v35 = vsel %vm253_vm5, %v968_v33, %v966_v50  ;;  %v1152_v53 = vpop.permute.xlu0 %1151  ;;  %v1001_v33 = vld [vmem:[#allocation3 + $0x10] ss:$8 sm:$0x3] }
 0x378   :  { %v933_v38 = vrot.slane %v1615_v32, 6  ;;  %v983_v39 = vmul.f32 %v976_v27, %v969_v34  ;;  %v984_v40 = vmul.f32 %v980_v30, %v970_v35  ;;  %v1196_v32 = vrot.slane %v1187_v21, %v1850_v11 }
 0x37a   :  { %935 = vst [vmem:[#allocation2 + $0x20] sm:$0xcc] %v933_v38  ;;  %v1617_v43 = vpack.c.bf16 %v984_v40, %v983_v39  ;;  %v1027_v44 = vpop.permute.xlu1 %1026  ;;  %v1006_v38 = vrot.slane %v1001_v33, %v1848_v10 }
 0x37b   :  { %v1028_v45 = vsel %vm56_vm1, %v1025_v0, %v1027_v44  ;;  %v1029_v46 = vsel %vm56_vm1, %v1027_v44, %v1025_v0  ;;  %v1211_v3 = vpop.permute.xlu0 %1210 }
 0x37c   :  { %v992_v48 = vrot.slane %v1617_v43, 6  ;;  %v1042_v49 = vmul.f32 %v1035_v36, %v1029_v46  ;;  %v1043_v50 = vmul.f32 %v1039_v41, %v1028_v45  ;;  %v1010_v45 = vrot.slane %v1001_v33, %v1850_v11  ;;  %v1246_v46 = vld [vmem:[#allocation3 + $0x10] ss:$8 sm:$0x3] }
 0x37e   :  { %994 = vst [vmem:[#allocation2 + $0x30] sm:$0xcc] %v992_v48  ;;  %v1619_v54 = vpack.c.bf16 %v1043_v50, %v1042_v49  ;;  %v1086_v55 = vpop.permute.xlu1 %1085 }
 0x37f   :  { %v1087_v56 = vsel %vm118_vm3, %v1084_v20, %v1086_v55  ;;  %v1088_v57 = vsel %vm118_vm3, %v1086_v55, %v1084_v20  ;;  %v1225_v20 = vrot.slane %v1216_v12, %v1850_v11  ;;  %v1182_v22 = vpop.permute.xlu0 %1181 }
 0x380   :  { %1052 = vst [vmem:[#allocation2 + $0x8] sm:$0x33] %v1619_v54  ;;  %v1101_v58 = vmul.f32 %v1094_v47, %v1088_v57  ;;  %v1102_v59 = vmul.f32 %v1098_v51, %v1087_v56  ;;  %v1255_v54 = vrot.slane %v1246_v46, %v1850_v11 }
 0x382   :  { %v1621_v63 = vpack.c.bf16 %v1102_v59, %v1101_v58  ;;  %v939_v0 = vpop.permute.xlu1 %938 }
 0x383   :  { %v940_v1 = vsel %vm222_vm6, %v937_v37, %v939_v0  ;;  %v941_v2 = vsel %vm222_vm6, %v939_v0, %v937_v37  ;;  %v996_v41 = vpop.permute.xlu0 %995 }
 0x384   :  { %1111 = vst [vmem:[#allocation2 + $0x18] sm:$0x33] %v1621_v63  ;;  %v954_v4 = vmul.f32 %v947_v60, %v940_v1  ;;  %v955_v5 = vmul.f32 %v951_v61, %v941_v2 }
 0x386   :  { %v1616_v13 = vpack.c.bf16 %v955_v5, %v954_v4  ;;  %v1154_v14 = vpop.permute.xlu1 %1153 }
 0x387   :  { %v1155_v15 = vsel %vm190_vm4, %v1152_v53, %v1154_v14  ;;  %v1156_v16 = vsel %vm190_vm4, %v1154_v14, %v1152_v53  ;;  %v1251_v53 = vrot.slane %v1246_v46, %v1848_v10  ;;  %v1241_v55 = vpop.permute.xlu0 %1240 }
 0x388   :  { %964 = vst [vmem:[#allocation2 + $0x30] sm:$0x33] %v1616_v13  ;;  %v1169_v17 = vmul.f32 %v1162_v7, %v1155_v15  ;;  %v1170_v18 = vmul.f32 %v1166_v8, %v1156_v16 }
 0x38a   :  { %v1624_v23 = vpack.c.bf16 %v1170_v18, %v1169_v17  ;;  %v1213_v24 = vpop.permute.xlu1 %1212 }
 0x38b   :  { %v1214_v25 = vsel %vm253_vm5, %v1211_v3, %v1213_v24  ;;  %v1215_v26 = vsel %vm253_vm5, %v1213_v24, %v1211_v3  ;;  %v1665_v27 = vld [vmem:[#allocation2 + $0x8] ss:$16 sps:$4 sm:$0xff]   ;;  %v1667_v28 = vld [vmem:[#allocation2 + $0xc] ss:$16 sps:$4 sm:$0xff]  }
 0x38c   :  { %v1178_v6 = vrot.slane %v1624_v23, 6  ;;  %v1228_v30 = vmul.f32 %v1221_v19, %v1214_v25  ;;  %v1229_v31 = vmul.f32 %v1225_v20, %v1215_v26  ;;  %1385 = vmatprep.subr.bf16.mxu1 %v1667_v28 }
 0x38d   :  { %1386 = vmatpush1.bf16.msra.mxu1 %v1665_v27 }
 0x38e   :  { %1180 = vst [vmem:[#allocation2 + $0x28] sm:$0xcc] %v1178_v6  ;;  %v1626_v34 = vpack.c.bf16 %v1229_v31, %v1228_v30  ;;  %v1184_v35 = vpop.permute.xlu1 %1183 }
 0x38f   :  { %v1185_v36 = vsel %vm222_vm6, %v1182_v22, %v1184_v35  ;;  %v1186_v37 = vsel %vm222_vm6, %v1184_v35, %v1182_v22  ;;  %v1668_v39 = vld [vmem:[#allocation2 + $0x20] ss:$16 sps:$4 sm:$0xff]   ;;  %v1670_v40 = vld [vmem:[#allocation2 + $0x24] ss:$16 sps:$4 sm:$0xff]  }
 0x390   :  { %v1237_v42 = vrot.slane %v1626_v34, 6  ;;  %v1199_v43 = vmul.f32 %v1192_v29, %v1185_v36  ;;  %v1200_v44 = vmul.f32 %v1196_v32, %v1186_v37  ;;  %1346 = vmatprep.subr.bf16.mxu0 %v1670_v40 }
 0x391   :  { %1347 = vmatpush1.bf16.msra.mxu0 %v1668_v39 }
 0x392   :  { %1239 = vst [vmem:[#allocation2 + $0x38] sm:$0xcc] %v1237_v42  ;;  %v1625_v47 = vpack.c.bf16 %v1200_v44, %v1199_v43  ;;  %v998_v48 = vpop.permute.xlu1 %997  ;;  %v1453_v44 = vld [vmem:[%s2156_s6] sm:$0xf]  ;;  %s1743_s6 = smov [#allocation6]  }
 0x393   :  { %v999_v49 = vsel %vm285_vm7, %v996_v41, %v998_v48  ;;  %v1000_v50 = vsel %vm285_vm7, %v998_v48, %v996_v41 }
 0x394   :  { %1209 = vst [vmem:[#allocation2 + $0x38] sm:$0x33] %v1625_v47  ;;  %v1013_v51 = vmul.f32 %v1006_v38, %v999_v49  ;;  %v1014_v52 = vmul.f32 %v1010_v45, %v1000_v50  ;;  %v1466_v47 = vld [vmem:[%s2157_s7] sm:$0xf]  ;;  %s1510_s7 = sshll.u32 %s1743_s6, 4  ;;  %s1511_s7 = int_to_ptr.vmem [resolvable:$true] %s1510_s7 }
 0x395   :  { %v1478_v50 = vld [vmem:[%s2150_s0] sm:$0xff]  ;;  %p1711_p9 = scmp.lt.s32.totalorder %s1511_s7, %s1511_s7 }
 0x396   :  { %v1618_v56 = vpack.c.bf16 %v1014_v52, %v1013_v51  ;;  %v1243_v57 = vpop.permute.xlu1 %1242  ;;  %v1591_v51 = vld [vmem:[%s2150_s0 + $0x8] sm:$0xff]  ;;  %s1706_s0 = scalar_lea.vmem %s1511_s7, 256 }
 0x397   :  { %v1244_v58 = vsel %vm285_vm7, %v1241_v55, %v1243_v57  ;;  %v1245_v59 = vsel %vm285_vm7, %v1243_v57, %v1241_v55  ;;  %p1707_p8 = scmp.ne.s32.totalorder %s1511_s7, %s1706_s0  ;;  %p1712_p10 = scmp.lt.s32.totalorder %s1706_s0, %s1706_s0 }
 0x398   :  { %1023 = vst [vmem:[#allocation2 + $0x40] sm:$0x33] %v1618_v56  ;;  %v1258_v60 = vmul.f32 %v1251_v53, %v1244_v58  ;;  %v1259_v61 = vmul.f32 %v1255_v54, %v1245_v59  ;;  %v1480_v53 = vcombine.high %v1478_v50, %v1478_v50  ;;  %v1493_v54 = vcombine.high %v1591_v51, %v1591_v51 }
 0x399   :  { %p1713_p11 = por %p1712_p10, %p1711_p9 }
 0x39a   :  { %v1627_v62 = vpack.c.bf16 %v1259_v61, %v1258_v60 }
 0x39b   :  { %v1671_v63 = vld [vmem:[#allocation2 + $0x28] ss:$16 sps:$4 sm:$0xff]   ;;  %v1673_v0 = vld [vmem:[#allocation2 + $0x2c] ss:$16 sps:$4 sm:$0xff]   ;;  %p1714_p12 = pnand %p1713_p11, %p1707_p8 }
 0x39c   :  { %1268 = vst [vmem:[#allocation2 + $0x48] sm:$0x33] %v1627_v62  ;;  %1387 = vmatprep.subr.bf16.mxu1 %v1673_v0 }
 0x39d   :  { %1388 = vmatpush1.bf16.msra.mxu1 %v1671_v63 }
 0x39f   :  { %v1277_v10 = vld [vmem:[#allocation2 + $0x40] sm:$0x33] }
 0x3a0   :  { %v1584_v11 = vcombine.high %v1277_v10, %v1277_v10  ;;  %v1583_v1 = vcombine.low %v1277_v10, %v1277_v10 }
 0x3a2   :  { %1587 = vmatprep.subr.msk.bf16.mxu0 %vm626_vm8, %v1584_v11  ;;  %v1333_v2 = vsel %vm626_vm8, %v1583_v1, 0 }
 0x3a3   :  { %1349 = vmatpush1.bf16.msra.mxu0 %v1333_v2  ;;  %v1278_v3 = vld [vmem:[#allocation2 + $0x48] sm:$0x33] }
 0x3a4   :  { %v1586_v4 = vcombine.high %v1278_v3, %v1278_v3  ;;  %v1585_v5 = vcombine.low %v1278_v3, %v1278_v3 }
 0x3a6   :  { %1588 = vmatmul.mubr.msk.bf16.vlgmr.msra.gmra.mrb[4].mxu0 %vm622_vm9, %v778_v9  ;;  %1589 = vmatprep.subr.msk.bf16.mxu1 %vm626_vm8, %v1586_v4  ;;  %v1339_v7 = vsel %vm626_vm8, %v1585_v5, 0 }
 0x3a7   :  { %1390 = vmatpush1.bf16.msra.mxu1 %v1339_v7 }
 0x3aa   :  { %1590 = vmatmul.mubr.msk.bf16.vlgmr.msra.gmra.mrb[4].mxu1 %vm622_vm9, %v778_v9 }
 0x479   :  { %v1378_v8 = vpop.f32.mrb[4].mxu0 }
 0x47a   :  { %v1426_v12 = vsel %vm721_vm10, %v1378_v8, 0.0  ;;  %v1435_v13 = vmul.f32 %v1378_v8, %v1378_v8  ;;  %v1380_v14 = vpop.f32.mrb[5].mxu0 }
 0x47b   :  { %v1427_v15 = vsel %vm721_vm10, %v1380_v14, 0.0  ;;  %v1436_v16 = vmul.f32 %v1380_v14, %v1380_v14  ;;  %v1382_v17 = vpop.f32.mrb[6].mxu0 }
 0x47c   :  { %v1439_v18 = vsel %vm721_vm10, %v1435_v13, 0.0  ;;  %v1428_v19 = vadd.f32 %v1427_v15, %v1426_v12  ;;  %v1383_v20 = vpop.f32.mrb[7].mxu0 }
 0x47d   :  { %v1440_v21 = vsel %vm721_vm10, %v1436_v16, 0.0  ;;  %v1419_v22 = vpop.f32.mrb[4].mxu1 }
 0x47e   :  { %v1429_v23 = vsel %vm721_vm10, %v1419_v22, 0.0  ;;  %v1437_v24 = vmul.f32 %v1419_v22, %v1419_v22  ;;  %v1421_v25 = vpop.f32.mrb[5].mxu1  ;;  %v1441_v26 = vadd.f32 %v1440_v21, %v1439_v18 }
 0x47f   :  { %v1438_v27 = vmul.f32 %v1421_v25, %v1421_v25  ;;  %v1423_v28 = vpop.f32.mrb[6].mxu1  ;;  %v1430_v29 = vadd.f32 %v1429_v23, %v1428_v19  ;;  %v1431_v6 = vsel %vm721_vm10, %v1421_v25, 0.0 }
 0x480   :  { %v1424_v30 = vpop.f32.mrb[7].mxu1  ;;  %v1442_v31 = vsel %vm721_vm10, %v1437_v24, 0.0 }
 0x481   :  { %v1432_v32 = vadd.f32 %v1431_v6, %v1430_v29  ;;  %v1443_v33 = vadd.f32 %v1442_v31, %v1441_v26  ;;  %v1444_v34 = vsel %vm721_vm10, %v1438_v27, 0.0 }
 0x483   :  { %1433 = vadd.xlane.f32.xlu0 %v1432_v32  ;;  %v1445_v35 = vadd.f32 %v1444_v34, %v1443_v33 }
 0x485   :  { %1446 = vadd.xlane.f32.xlu1 %v1445_v35 }
 0x510   :  { %v1434_v36 = vpop.xlane.xlu0 %1433 }
 0x511   :  { %v1448_v37 = vmul.f32 0.001953125, %v1434_v36 }
 0x512   :  { %v1447_v38 = vpop.xlane.xlu1 %1446 }
 0x513   :  { %v1450_v39 = vmul.f32 %v1448_v37, %v1448_v37  ;;  %v1449_v40 = vmul.f32 0.001953125, %v1447_v38 }
 0x515   :  { %v1451_v41 = vsub.f32 %v1449_v40, %v1450_v39 }
 0x517   :  { %v1452_v42 = vmax.f32 %v1451_v41, 0.0 }
 0x519   :  { %v1454_v43 = vadd.f32 1e-05, %v1452_v42 }
 0x51b   :  { %1682 = vrsqrt.f32 %v1454_v43 }
 0x525   :  { %v1683_v45 = vpop.eup %1682 }
 0x526   :  { %v1456_v46 = vmul.f32 %v1683_v45, %v1453_v44 }
 0x528   :  { %1459 = vperm.xlu0 %1642, %v1456_v46   ;;  %v1467_v48 = vmul.f32 %v1456_v46, %v1448_v37 }
 0x52a   :  { %v1468_v49 = vsub.f32 %v1466_v47, %v1467_v48 }
 0x52c   :  { %1471 = vperm.xlu1 %1643, %v1468_v49  }
 0x5a7   :  { %v1460_v52 = vpop.permute.xlu0 %1459 }
 0x5a8   :  { %v1462_v55 = vmul.f32 %v1460_v52, %v1378_v8  ;;  %v1463_v56 = vmul.f32 %v1460_v52, %v1380_v14  ;;  %v1464_v57 = vmul.f32 %v1460_v52, %v1419_v22  ;;  %v1465_v58 = vmul.f32 %v1460_v52, %v1421_v25 }
 0x5ab   :  { %v1472_v59 = vpop.permute.xlu1 %1471 }
 0x5ac   :  { %v1474_v60 = vadd.f32 %v1472_v59, %v1462_v55  ;;  %v1475_v61 = vadd.f32 %v1472_v59, %v1463_v56  ;;  %v1476_v62 = vadd.f32 %v1472_v59, %v1464_v57  ;;  %v1477_v63 = vadd.f32 %v1472_v59, %v1465_v58 }
 0x5ae   :  { %v1482_v0 = vadd.f32 %v1478_v50, %v1474_v60  ;;  %v1483_v10 = vadd.f32 %v1480_v53, %v1475_v61  ;;  %v1495_v11 = vadd.f32 %v1591_v51, %v1476_v62  ;;  %v1496_v1 = vadd.f32 %v1493_v54, %v1477_v63 }
 0x5b0   :  { %v1484_v2 = vmax.f32 %v1482_v0, 0.0  ;;  %v1485_v9 = vmax.f32 %v1483_v10, 0.0  ;;  %v1497_v3 = vmax.f32 %v1495_v11, 0.0  ;;  %v1498_v4 = vmax.f32 %v1496_v1, 0.0 }
 0x5b2   :  { %v1488_v5 = vcombine.low %v1484_v2, %v1485_v9  ;;  %v1501_v7 = vcombine.low %v1497_v3, %v1498_v4 }
 0x5b4   :  { %1490 = vst [vmem:[#allocation6] sm:$0xff] %v1488_v5  ;;  %1504 = vst [vmem:[#allocation6 + $0x8] sm:$0xff] %v1501_v7 }
 0x5b5   :  { %1717 = shalt.err (!%p1714_p12)
}
 0x5b6   :  { %s1718_s21 = scalar_lea.hbm %s2158_s8, 256 }
 0x5b7   :  { %p1719_p13 = scmp.ne.s32.totalorder %s2158_s8, %s1718_s21  ;;  %p1722_p0 = scmp.lt.u32.totalorder %s1718_s21, %s2158_s8 }
 0x5b9   :  { %p1724_p1 = pnand %p1722_p0, %p1719_p13 }
 0x5bb   :  { %1727 = shalt.err (!%p1724_p1)
}
 0x5bc   :  { %s1744_s25 = smov 128   ;;  %s1745_s26 = smov 8  }
 0x5bd   :  { %1516 = dma.vmem_to_hbm [thread:$0]  %s1511_s7, 256, %s2158_s8, [#allocation5], %s1744_s25, %s1744_s25, %s1745_s26  }
 0x5be   :  { %1730 = dma.done.wait [#allocation5], 256  }
 0x5bf   :  { %1731 = vsyncadd [#allocation5], 4294967040 }
 0x5c0   :  { %1520 = vsyncpa [#allocation4], 1 }
 0x5c1   :  { %1521 = vsyncpa [#allocation5], 1 }

</bundles_post_ra>
